<compile_context>
chip_gen: v7x
topology: tpu7x:2x2x1
jax: 0.10.0
libtpu: 0.0.40
codegen_flags: <defaults>
</compile_context>

<pallas_src>
import functools

import jax
import jax.numpy as jnp
from jax.experimental import pallas as pl
from jax.experimental.pallas import tpu as pltpu


def _round_up(n: int, m: int) -> int:
    return ((n + m - 1) // m) * m


def _xla_forward(x, params):
    """Pure-XLA reference / small-batch fallback (faithful f32 like PyTorch)."""
    hp = jax.lax.Precision.HIGHEST
    x = x.astype(jnp.float32)
    h = jnp.maximum(jnp.dot(x, params["w1"], precision=hp) + params["b1"], 0.0)
    h = jnp.maximum(jnp.dot(h, params["w2"], precision=hp) + params["b2"], 0.0)
    return jnp.dot(h, params["w3"], precision=hp) + params["b3"]


def pack_params(params, *, bands):
    """Pack parameters for the banded kernel.

    Returns:
      pw2:    [R*H, 2*R*H] bf16 -- block-diagonal W2^T, split into (hi | lo)
              bf16 parts for the manual bf16_3x (precision-HIGH-equivalent) dot.
      psmall: [R*H, 1+IN+3] f32 -- col 0: b2 tiled per band; cols 1..IN: W1^T
              columns; then b1, w3, b3.  b3 lives at row 0 of its column (the
              kernel reads psmall[0:1, 3+IN:4+IN]).
    """
    IN, H = params["w1"].shape
    R = bands
    RH = R * H
    f32 = jnp.float32

    # Block-diagonal layer-2 weight (transposed so it left-multiplies h1).
    w2t = params["w2"].astype(f32).T                            # [H_out, H_in]
    w2_big = jnp.kron(jnp.eye(R, dtype=f32), w2t)               # [RH, RH]
    w2_hi = w2_big.astype(jnp.bfloat16)
    w2_lo = (w2_big - w2_hi.astype(f32)).astype(jnp.bfloat16)
    pw2 = jnp.concatenate([w2_hi, w2_lo], axis=1)               # [RH, 2*RH] bf16

    def col(v):  # zero-pad a column vector to RH rows
        v = v.astype(f32).reshape(-1, 1)
        return jnp.zeros((RH, 1), f32).at[: v.shape[0], :].set(v)

    cols = [jnp.tile(params["b2"].astype(f32).reshape(H, 1), (R, 1))]  # b2_big
    cols += [col(params["w1"][i, :]) for i in range(IN)]               # W1^T cols
    cols += [col(params["b1"]), col(params["w3"]), col(params["b3"])]
    psmall = jnp.concatenate(cols, axis=1)                             # [RH, 1+IN+3]
    assert psmall.shape == (RH, 1 + IN + 3)
    return pw2, psmall


def _mlp_banded_kernel(x_ref, w2_ref, ps_ref, o_ref, h1_hi_ref, h1_lo_ref, *,
                       input_size, hidden_size, bands):
    """x_ref: [R*IN, T] (band r, feature i at row r*IN+i; batch on lanes),
    w2_ref: [R*H, 2*R*H] bf16 (hi | lo), ps_ref: [R*H, 1+IN+3] f32,
    o_ref: [R, T] f32, h1_{hi,lo}_ref: [R*H, T] bf16 scratch."""
    IN, H, R = input_size, hidden_size, bands
    RH = R * H
    f32 = jnp.float32

    # Small parameters (tiny, grid-invariant reads).
    b2_big = ps_ref[:, 0:1]                                     # [RH, 1]
    w1_cols = [ps_ref[0:H, 1 + i:2 + i] for i in range(IN)]     # IN x [H, 1]
    b1 = ps_ref[0:H, 1 + IN:2 + IN]                             # [H, 1]
    w3 = ps_ref[0:H, 2 + IN:3 + IN]                             # [H, 1]
    b3 = ps_ref[0:1, 3 + IN:4 + IN]                             # [1, 1]

    # Layer 1: K = IN is tiny -> per-band broadcast FMAs on the VPU (no MXU).
    # Store the bf16 hi/lo split of h1 straight into VMEM scratch (avoids a
    # full f32 h1 and feeds the bf16_3x matmul below).
    for r in range(R):
        acc = w1_cols[0] * x_ref[r * IN:r * IN + 1, :]          # [H, T]
        for i in range(1, IN):
            acc = acc + w1_cols[i] * x_ref[r * IN + i:r * IN + i + 1, :]
        acc = jnp.maximum(acc + b1, 0.0)                         # [H, T] f32
        hi = acc.astype(jnp.bfloat16)
        h1_hi_ref[r * H:(r + 1) * H, :] = hi
        h1_lo_ref[r * H:(r + 1) * H, :] = (acc - hi.astype(f32)).astype(jnp.bfloat16)

    # Layer 2: block-diagonal [RH, RH] weight on the MXU, bf16_3x decomposition
    # (equivalent to precision=HIGH: 3 bf16 passes, ~1e-6 relative error).
    w2_hi = w2_ref[:, 0:RH]
    w2_lo = w2_ref[:, RH:2 * RH]
    h1_hi = h1_hi_ref[...]
    h1_lo = h1_lo_ref[...]
    h2 = jnp.dot(w2_hi, h1_hi, preferred_element_type=f32)
    h2 = h2 + jnp.dot(w2_hi, h1_lo, preferred_element_type=f32)
    h2 = h2 + jnp.dot(w2_lo, h1_hi, preferred_element_type=f32)
    h2 = jnp.maximum(h2 + b2_big, 0.0)                           # [RH, T] f32

    # Layer 3: output width 1 per band -> VPU multiply + XLU sublane reduce.
    for r in range(R):
        band = w3 * h2[r * H:(r + 1) * H, :]                    # [H, T]
        o_ref[r:r + 1, :] = jnp.sum(band, axis=0, keepdims=True) + b3


def communication_predictor_forward(x, params, *, bands=8, block_cols=4096,
                                    min_pallas_batch=2048,
                                    vmem_limit_bytes=48 * 1024 * 1024):
    """x: [batch, input_size] float32 -> [batch, 1] float32.

    bands: sublane bands for the block-diagonal layer-2 weight. 8 fills the
      256x256 MXU on v6e/v7x; use 4 on v5e (128x128 MXU).
    block_cols: band-columns per grid step (batch elements per step =
      bands*block_cols). Lower it on v7x if you want >=4 grid steps so both
      TensorCores get work via dimension_semantics=("parallel",).
    """
    IN, H = params["w1"].shape
    assert H % 8 == 0, "hidden_size must be a multiple of 8 (sublane tile)"
    B = x.shape[0]

    # Tiny batches: the Pallas launch + layout plumbing is pure overhead; let
    # XLA fuse the whole 3->32->32->1 MLP instead.
    if B < min_pallas_batch:
        return _xla_forward(x, params)

    R = bands
    RH = R * H

    # Columns per band (batch split into R contiguous chunks, lane-aligned).
    Bc = _round_up(pl.cdiv(B, R), 128)

    # VMEM-derived cap on the tile width: live footprint ~5.6 KB / band-column
    # (bf16 h1 hi/lo scratch + f32 h2/temps + double-buffered x/out tiles).
    max_cols = max(128, ((vmem_limit_bytes - (4 << 20)) // 5600) // 128 * 128)
    block_cols = min(block_cols, max_cols)

    n_steps = pl.cdiv(Bc, block_cols)
    tmb = _round_up(pl.cdiv(Bc, n_steps), 128)   # band-columns per grid step
    Bc_pad = n_steps * tmb
    B_pad = R * Bc_pad

    pw2, psmall = pack_params(params, bands=R)

    # Banded input layout: row r*IN + i, column j holds x[r*Bc_pad + j, i].
    # jnp.pad (not zeros+scatter) + one small 3-row transpose.
    x_pad = jnp.pad(x.astype(jnp.float32), ((0, B_pad - B), (0, 0)))
    x_banded = x_pad.reshape(R, Bc_pad, IN).transpose(0, 2, 1).reshape(R * IN, Bc_pad)

    kernel = functools.partial(_mlp_banded_kernel, input_size=IN,
                               hidden_size=H, bands=R)

    out_banded = pl.pallas_call(
        kernel,
        out_shape=jax.ShapeDtypeStruct((R, Bc_pad), jnp.float32),
        grid=(n_steps,),
        in_specs=[
            pl.BlockSpec((R * IN, tmb), lambda i: (0, i)),          # x tile
            pl.BlockSpec((RH, 2 * RH), lambda i: (0, 0)),           # W2 hi|lo (invariant)
            pl.BlockSpec((RH, psmall.shape[1]), lambda i: (0, 0)),  # small params (invariant)
        ],
        out_specs=pl.BlockSpec((R, tmb), lambda i: (0, i)),
        scratch_shapes=[
            pltpu.VMEM((RH, tmb), jnp.bfloat16),   # h1 hi
            pltpu.VMEM((RH, tmb), jnp.bfloat16),   # h1 lo
        ],
        compiler_params=pltpu.CompilerParams(
            dimension_semantics=("parallel",),     # shards batch tiles across TCs
            vmem_limit_bytes=vmem_limit_bytes,     # <=48MiB: safe on v7x's 64MiB
        ),
    )(x_banded, pw2, psmall)

    # Band r, column c is batch element r*Bc_pad + c -> a pure reshape + slice.
    return out_banded.reshape(-1)[:B].reshape(B, 1)


def init_params(key, input_size=3, hidden_size=32):
    """Deterministic init matching nn.Linear shapes (weights stored as [in, out])."""
    k1, k2, k3, k4, k5, k6 = jax.random.split(key, 6)

    def linear_init(kw, kb, fan_in, fan_out):
        bound = 1.0 / jnp.sqrt(jnp.float32(fan_in))
        w = jax.random.uniform(kw, (fan_in, fan_out), jnp.float32, -bound, bound)
        b = jax.random.uniform(kb, (1, fan_out), jnp.float32, -bound, bound)
        return w, b

    w1, b1 = linear_init(k1, k2, input_size, hidden_size)
    w2, b2 = linear_init(k3, k4, hidden_size, hidden_size)
    w3, b3 = linear_init(k5, k6, hidden_size, 1)
    return {"w1": w1, "b1": b1, "w2": w2, "b2": b2, "w3": w3, "b3": b3}


if __name__ == "__main__":
    key = jax.random.PRNGKey(0)
    k_x, k_p, k_x2 = jax.random.split(key, 3)

    input_size, hidden_size = 3, 32
    params = init_params(k_p, input_size=input_size, hidden_size=hidden_size)

    # 1) Small batch forced through the Pallas path (single grid step).
    x1 = jax.random.normal(k_x, (8, input_size), dtype=jnp.float32)
    out1 = jax.block_until_ready(
        communication_predictor_forward(x1, params, min_pallas_batch=0))
    ref1 = _xla_forward(x1, params)
    assert out1.shape == (8, 1)
    assert jnp.allclose(out1, ref1, atol=1e-4, rtol=1e-4)

    # 2) Larger, non-aligned batch through a multi-step grid (3 tiles of 128
    #    band-columns each; batch is not a multiple of the tile).
    x2 = jax.random.normal(k_x2, (3000, input_size), dtype=jnp.float32)
    out2 = jax.block_until_ready(
        communication_predictor_forward(x2, params, block_cols=128,
                                        min_pallas_batch=0))
    ref2 = _xla_forward(x2, params)
    assert out2.shape == (3000, 1)
    assert jnp.allclose(out2, ref2, atol=1e-4, rtol=1e-4)

    # 3) Small-batch fallback path (pure XLA, no Pallas launch).
    out3 = jax.block_until_ready(communication_predictor_forward(x1, params))
    assert jnp.allclose(out3, ref1, atol=1e-6, rtol=1e-6)

    print("KERNEL_OK")
</pallas_src>

<mosaic_0001>
module attributes {stable_mosaic.version = 11 : i64} {
  func.func @_mlp_banded_kernel(%arg0: i32, %arg1: memref<24x128xf32, #tpu.memory_space<vmem>>, %arg2: memref<256x512xbf16, #tpu.memory_space<vmem>>, %arg3: memref<256x7xf32, #tpu.memory_space<vmem>>, %arg4: memref<8x128xf32, #tpu.memory_space<vmem>>, %arg5: memref<256x128xbf16, #tpu.memory_space<vmem>>, %arg6: memref<256x128xbf16, #tpu.memory_space<vmem>>) attributes {dimension_semantics = [#tpu.dimension_semantics<parallel>], iteration_bounds = array<i64: 1>, scalar_prefetch = 0 : i64, scratch_operands = 2 : i64, tpu.core_type = #tpu.core_type<tc>, window_params = [{transform_indices = @transform_0, window_bounds = array<i64: 24, 128>}, {pipeline_mode = #tpu.pipeline_mode<synchronous>, transform_indices = @transform_1, window_bounds = array<i64: 256, 512>}, {pipeline_mode = #tpu.pipeline_mode<synchronous>, transform_indices = @transform_2, window_bounds = array<i64: 256, 7>}, {transform_indices = @transform_3, window_bounds = array<i64: 8, 128>}]} {
    %c0 = arith.constant 0 : index
    %c0_0 = arith.constant 0 : index
    %0 = vector.load %arg3[%c0, %c0_0] : memref<256x7xf32, #tpu.memory_space<vmem>>, vector<256x1xf32>
    %c0_1 = arith.constant 0 : index
    %c1 = arith.constant 1 : index
    %1 = vector.load %arg3[%c0_1, %c1] : memref<256x7xf32, #tpu.memory_space<vmem>>, vector<32x1xf32>
    %c0_2 = arith.constant 0 : index
    %c2 = arith.constant 2 : index
    %2 = vector.load %arg3[%c0_2, %c2] : memref<256x7xf32, #tpu.memory_space<vmem>>, vector<32x1xf32>
    %c0_3 = arith.constant 0 : index
    %c3 = arith.constant 3 : index
    %3 = vector.load %arg3[%c0_3, %c3] : memref<256x7xf32, #tpu.memory_space<vmem>>, vector<32x1xf32>
    %c0_4 = arith.constant 0 : index
    %c4 = arith.constant 4 : index
    %4 = vector.load %arg3[%c0_4, %c4] : memref<256x7xf32, #tpu.memory_space<vmem>>, vector<32x1xf32>
    %c0_5 = arith.constant 0 : index
    %c5 = arith.constant 5 : index
    %5 = vector.load %arg3[%c0_5, %c5] : memref<256x7xf32, #tpu.memory_space<vmem>>, vector<32x1xf32>
    %c0_6 = arith.constant 0 : index
    %c6 = arith.constant 6 : index
    %6 = vector.load %arg3[%c0_6, %c6] : memref<256x7xf32, #tpu.memory_space<vmem>>, vector<1x1xf32>
    %c0_7 = arith.constant 0 : index
    %c0_8 = arith.constant 0 : index
    %7 = vector.load %arg1[%c0_7, %c0_8] : memref<24x128xf32, #tpu.memory_space<vmem>>, vector<1x128xf32>
    %8 = vector.broadcast %1 : vector<32x1xf32> to vector<32x128xf32>
    %9 = vector.broadcast %7 : vector<1x128xf32> to vector<32x128xf32>
    %10 = arith.mulf %8, %9 : vector<32x128xf32>
    %c1_9 = arith.constant 1 : index
    %c0_10 = arith.constant 0 : index
    %11 = vector.load %arg1[%c1_9, %c0_10] : memref<24x128xf32, #tpu.memory_space<vmem>>, vector<1x128xf32>
    %12 = vector.broadcast %2 : vector<32x1xf32> to vector<32x128xf32>
    %13 = vector.broadcast %11 : vector<1x128xf32> to vector<32x128xf32>
    %14 = arith.mulf %12, %13 : vector<32x128xf32>
    %15 = arith.addf %10, %14 : vector<32x128xf32>
    %c2_11 = arith.constant 2 : index
    %c0_12 = arith.constant 0 : index
    %16 = vector.load %arg1[%c2_11, %c0_12] : memref<24x128xf32, #tpu.memory_space<vmem>>, vector<1x128xf32>
    %17 = vector.broadcast %3 : vector<32x1xf32> to vector<32x128xf32>
    %18 = vector.broadcast %16 : vector<1x128xf32> to vector<32x128xf32>
    %19 = arith.mulf %17, %18 : vector<32x128xf32>
    %20 = arith.addf %15, %19 : vector<32x128xf32>
    %21 = vector.broadcast %4 : vector<32x1xf32> to vector<32x128xf32>
    %22 = arith.addf %20, %21 : vector<32x128xf32>
    %cst = arith.constant 0.000000e+00 : f32
    %23 = vector.broadcast %cst : f32 to vector<32x128xf32>
    %24 = arith.maximumf %22, %23 : vector<32x128xf32>
    %25 = arith.truncf %24 : vector<32x128xf32> to vector<32x128xbf16>
    %c0_13 = arith.constant 0 : index
    %c0_14 = arith.constant 0 : index
    %26 = vector.load %arg5[%c0_13, %c0_14] : memref<256x128xbf16, #tpu.memory_space<vmem>>, vector<32x128xbf16>
    tpu.vector_store %arg5[%c0_13, %c0_14], %25 {strides = array<i32>} : memref<256x128xbf16, #tpu.memory_space<vmem>>, vector<32x128xbf16>,
    %27 = arith.extf %25 : vector<32x128xbf16> to vector<32x128xf32>
    %28 = arith.subf %24, %27 : vector<32x128xf32>
    %29 = arith.truncf %28 : vector<32x128xf32> to vector<32x128xbf16>
    %c0_15 = arith.constant 0 : index
    %c0_16 = arith.constant 0 : index
    %30 = vector.load %arg6[%c0_15, %c0_16] : memref<256x128xbf16, #tpu.memory_space<vmem>>, vector<32x128xbf16>
    tpu.vector_store %arg6[%c0_15, %c0_16], %29 {strides = array<i32>} : memref<256x128xbf16, #tpu.memory_space<vmem>>, vector<32x128xbf16>,
    %c3_17 = arith.constant 3 : index
    %c0_18 = arith.constant 0 : index
    %31 = vector.load %arg1[%c3_17, %c0_18] : memref<24x128xf32, #tpu.memory_space<vmem>>, vector<1x128xf32>
    %32 = vector.broadcast %1 : vector<32x1xf32> to vector<32x128xf32>
    %33 = vector.broadcast %31 : vector<1x128xf32> to vector<32x128xf32>
    %34 = arith.mulf %32, %33 : vector<32x128xf32>
    %c4_19 = arith.constant 4 : index
    %c0_20 = arith.constant 0 : index
    %35 = vector.load %arg1[%c4_19, %c0_20] : memref<24x128xf32, #tpu.memory_space<vmem>>, vector<1x128xf32>
    %36 = vector.broadcast %2 : vector<32x1xf32> to vector<32x128xf32>
    %37 = vector.broadcast %35 : vector<1x128xf32> to vector<32x128xf32>
    %38 = arith.mulf %36, %37 : vector<32x128xf32>
    %39 = arith.addf %34, %38 : vector<32x128xf32>
    %c5_21 = arith.constant 5 : index
    %c0_22 = arith.constant 0 : index
    %40 = vector.load %arg1[%c5_21, %c0_22] : memref<24x128xf32, #tpu.memory_space<vmem>>, vector<1x128xf32>
    %41 = vector.broadcast %3 : vector<32x1xf32> to vector<32x128xf32>
    %42 = vector.broadcast %40 : vector<1x128xf32> to vector<32x128xf32>
    %43 = arith.mulf %41, %42 : vector<32x128xf32>
    %44 = arith.addf %39, %43 : vector<32x128xf32>
    %45 = vector.broadcast %4 : vector<32x1xf32> to vector<32x128xf32>
    %46 = arith.addf %44, %45 : vector<32x128xf32>
    %cst_23 = arith.constant 0.000000e+00 : f32
    %47 = vector.broadcast %cst_23 : f32 to vector<32x128xf32>
    %48 = arith.maximumf %46, %47 : vector<32x128xf32>
    %49 = arith.truncf %48 : vector<32x128xf32> to vector<32x128xbf16>
    %c32 = arith.constant 32 : index
    %c0_24 = arith.constant 0 : index
    %50 = vector.load %arg5[%c32, %c0_24] : memref<256x128xbf16, #tpu.memory_space<vmem>>, vector<32x128xbf16>
    tpu.vector_store %arg5[%c32, %c0_24], %49 {strides = array<i32>} : memref<256x128xbf16, #tpu.memory_space<vmem>>, vector<32x128xbf16>,
    %51 = arith.extf %49 : vector<32x128xbf16> to vector<32x128xf32>
    %52 = arith.subf %48, %51 : vector<32x128xf32>
    %53 = arith.truncf %52 : vector<32x128xf32> to vector<32x128xbf16>
    %c32_25 = arith.constant 32 : index
    %c0_26 = arith.constant 0 : index
    %54 = vector.load %arg6[%c32_25, %c0_26] : memref<256x128xbf16, #tpu.memory_space<vmem>>, vector<32x128xbf16>
    tpu.vector_store %arg6[%c32_25, %c0_26], %53 {strides = array<i32>} : memref<256x128xbf16, #tpu.memory_space<vmem>>, vector<32x128xbf16>,
    %c6_27 = arith.constant 6 : index
    %c0_28 = arith.constant 0 : index
    %55 = vector.load %arg1[%c6_27, %c0_28] : memref<24x128xf32, #tpu.memory_space<vmem>>, vector<1x128xf32>
    %56 = vector.broadcast %1 : vector<32x1xf32> to vector<32x128xf32>
    %57 = vector.broadcast %55 : vector<1x128xf32> to vector<32x128xf32>
    %58 = arith.mulf %56, %57 : vector<32x128xf32>
    %c7 = arith.constant 7 : index
    %c0_29 = arith.constant 0 : index
    %59 = vector.load %arg1[%c7, %c0_29] : memref<24x128xf32, #tpu.memory_space<vmem>>, vector<1x128xf32>
    %60 = vector.broadcast %2 : vector<32x1xf32> to vector<32x128xf32>
    %61 = vector.broadcast %59 : vector<1x128xf32> to vector<32x128xf32>
    %62 = arith.mulf %60, %61 : vector<32x128xf32>
    %63 = arith.addf %58, %62 : vector<32x128xf32>
    %c8 = arith.constant 8 : index
    %c0_30 = arith.constant 0 : index
    %64 = vector.load %arg1[%c8, %c0_30] : memref<24x128xf32, #tpu.memory_space<vmem>>, vector<1x128xf32>
    %65 = vector.broadcast %3 : vector<32x1xf32> to vector<32x128xf32>
    %66 = vector.broadcast %64 : vector<1x128xf32> to vector<32x128xf32>
    %67 = arith.mulf %65, %66 : vector<32x128xf32>
    %68 = arith.addf %63, %67 : vector<32x128xf32>
    %69 = vector.broadcast %4 : vector<32x1xf32> to vector<32x128xf32>
    %70 = arith.addf %68, %69 : vector<32x128xf32>
    %cst_31 = arith.constant 0.000000e+00 : f32
    %71 = vector.broadcast %cst_31 : f32 to vector<32x128xf32>
    %72 = arith.maximumf %70, %71 : vector<32x128xf32>
    %73 = arith.truncf %72 : vector<32x128xf32> to vector<32x128xbf16>
    %c64 = arith.constant 64 : index
    %c0_32 = arith.constant 0 : index
    %74 = vector.load %arg5[%c64, %c0_32] : memref<256x128xbf16, #tpu.memory_space<vmem>>, vector<32x128xbf16>
    tpu.vector_store %arg5[%c64, %c0_32], %73 {strides = array<i32>} : memref<256x128xbf16, #tpu.memory_space<vmem>>, vector<32x128xbf16>,
    %75 = arith.extf %73 : vector<32x128xbf16> to vector<32x128xf32>
    %76 = arith.subf %72, %75 : vector<32x128xf32>
    %77 = arith.truncf %76 : vector<32x128xf32> to vector<32x128xbf16>
    %c64_33 = arith.constant 64 : index
    %c0_34 = arith.constant 0 : index
    %78 = vector.load %arg6[%c64_33, %c0_34] : memref<256x128xbf16, #tpu.memory_space<vmem>>, vector<32x128xbf16>
    tpu.vector_store %arg6[%c64_33, %c0_34], %77 {strides = array<i32>} : memref<256x128xbf16, #tpu.memory_space<vmem>>, vector<32x128xbf16>,
    %c9 = arith.constant 9 : index
    %c0_35 = arith.constant 0 : index
    %79 = vector.load %arg1[%c9, %c0_35] : memref<24x128xf32, #tpu.memory_space<vmem>>, vector<1x128xf32>
    %80 = vector.broadcast %1 : vector<32x1xf32> to vector<32x128xf32>
    %81 = vector.broadcast %79 : vector<1x128xf32> to vector<32x128xf32>
    %82 = arith.mulf %80, %81 : vector<32x128xf32>
    %c10 = arith.constant 10 : index
    %c0_36 = arith.constant 0 : index
    %83 = vector.load %arg1[%c10, %c0_36] : memref<24x128xf32, #tpu.memory_space<vmem>>, vector<1x128xf32>
    %84 = vector.broadcast %2 : vector<32x1xf32> to vector<32x128xf32>
    %85 = vector.broadcast %83 : vector<1x128xf32> to vector<32x128xf32>
    %86 = arith.mulf %84, %85 : vector<32x128xf32>
    %87 = arith.addf %82, %86 : vector<32x128xf32>
    %c11 = arith.constant 11 : index
    %c0_37 = arith.constant 0 : index
    %88 = vector.load %arg1[%c11, %c0_37] : memref<24x128xf32, #tpu.memory_space<vmem>>, vector<1x128xf32>
    %89 = vector.broadcast %3 : vector<32x1xf32> to vector<32x128xf32>
    %90 = vector.broadcast %88 : vector<1x128xf32> to vector<32x128xf32>
    %91 = arith.mulf %89, %90 : vector<32x128xf32>
    %92 = arith.addf %87, %91 : vector<32x128xf32>
    %93 = vector.broadcast %4 : vector<32x1xf32> to vector<32x128xf32>
    %94 = arith.addf %92, %93 : vector<32x128xf32>
    %cst_38 = arith.constant 0.000000e+00 : f32
    %95 = vector.broadcast %cst_38 : f32 to vector<32x128xf32>
    %96 = arith.maximumf %94, %95 : vector<32x128xf32>
    %97 = arith.truncf %96 : vector<32x128xf32> to vector<32x128xbf16>
    %c96 = arith.constant 96 : index
    %c0_39 = arith.constant 0 : index
    %98 = vector.load %arg5[%c96, %c0_39] : memref<256x128xbf16, #tpu.memory_space<vmem>>, vector<32x128xbf16>
    tpu.vector_store %arg5[%c96, %c0_39], %97 {strides = array<i32>} : memref<256x128xbf16, #tpu.memory_space<vmem>>, vector<32x128xbf16>,
    %99 = arith.extf %97 : vector<32x128xbf16> to vector<32x128xf32>
    %100 = arith.subf %96, %99 : vector<32x128xf32>
    %101 = arith.truncf %100 : vector<32x128xf32> to vector<32x128xbf16>
    %c96_40 = arith.constant 96 : index
    %c0_41 = arith.constant 0 : index
    %102 = vector.load %arg6[%c96_40, %c0_41] : memref<256x128xbf16, #tpu.memory_space<vmem>>, vector<32x128xbf16>
    tpu.vector_store %arg6[%c96_40, %c0_41], %101 {strides = array<i32>} : memref<256x128xbf16, #tpu.memory_space<vmem>>, vector<32x128xbf16>,
    %c12 = arith.constant 12 : index
    %c0_42 = arith.constant 0 : index
    %103 = vector.load %arg1[%c12, %c0_42] : memref<24x128xf32, #tpu.memory_space<vmem>>, vector<1x128xf32>
    %104 = vector.broadcast %1 : vector<32x1xf32> to vector<32x128xf32>
    %105 = vector.broadcast %103 : vector<1x128xf32> to vector<32x128xf32>
    %106 = arith.mulf %104, %105 : vector<32x128xf32>
    %c13 = arith.constant 13 : index
    %c0_43 = arith.constant 0 : index
    %107 = vector.load %arg1[%c13, %c0_43] : memref<24x128xf32, #tpu.memory_space<vmem>>, vector<1x128xf32>
    %108 = vector.broadcast %2 : vector<32x1xf32> to vector<32x128xf32>
    %109 = vector.broadcast %107 : vector<1x128xf32> to vector<32x128xf32>
    %110 = arith.mulf %108, %109 : vector<32x128xf32>
    %111 = arith.addf %106, %110 : vector<32x128xf32>
    %c14 = arith.constant 14 : index
    %c0_44 = arith.constant 0 : index
    %112 = vector.load %arg1[%c14, %c0_44] : memref<24x128xf32, #tpu.memory_space<vmem>>, vector<1x128xf32>
    %113 = vector.broadcast %3 : vector<32x1xf32> to vector<32x128xf32>
    %114 = vector.broadcast %112 : vector<1x128xf32> to vector<32x128xf32>
    %115 = arith.mulf %113, %114 : vector<32x128xf32>
    %116 = arith.addf %111, %115 : vector<32x128xf32>
    %117 = vector.broadcast %4 : vector<32x1xf32> to vector<32x128xf32>
    %118 = arith.addf %116, %117 : vector<32x128xf32>
    %cst_45 = arith.constant 0.000000e+00 : f32
    %119 = vector.broadcast %cst_45 : f32 to vector<32x128xf32>
    %120 = arith.maximumf %118, %119 : vector<32x128xf32>
    %121 = arith.truncf %120 : vector<32x128xf32> to vector<32x128xbf16>
    %c128 = arith.constant 128 : index
    %c0_46 = arith.constant 0 : index
    %122 = vector.load %arg5[%c128, %c0_46] : memref<256x128xbf16, #tpu.memory_space<vmem>>, vector<32x128xbf16>
    tpu.vector_store %arg5[%c128, %c0_46], %121 {strides = array<i32>} : memref<256x128xbf16, #tpu.memory_space<vmem>>, vector<32x128xbf16>,
    %123 = arith.extf %121 : vector<32x128xbf16> to vector<32x128xf32>
    %124 = arith.subf %120, %123 : vector<32x128xf32>
    %125 = arith.truncf %124 : vector<32x128xf32> to vector<32x128xbf16>
    %c128_47 = arith.constant 128 : index
    %c0_48 = arith.constant 0 : index
    %126 = vector.load %arg6[%c128_47, %c0_48] : memref<256x128xbf16, #tpu.memory_space<vmem>>, vector<32x128xbf16>
    tpu.vector_store %arg6[%c128_47, %c0_48], %125 {strides = array<i32>} : memref<256x128xbf16, #tpu.memory_space<vmem>>, vector<32x128xbf16>,
    %c15 = arith.constant 15 : index
    %c0_49 = arith.constant 0 : index
    %127 = vector.load %arg1[%c15, %c0_49] : memref<24x128xf32, #tpu.memory_space<vmem>>, vector<1x128xf32>
    %128 = vector.broadcast %1 : vector<32x1xf32> to vector<32x128xf32>
    %129 = vector.broadcast %127 : vector<1x128xf32> to vector<32x128xf32>
    %130 = arith.mulf %128, %129 : vector<32x128xf32>
    %c16 = arith.constant 16 : index
    %c0_50 = arith.constant 0 : index
    %131 = vector.load %arg1[%c16, %c0_50] : memref<24x128xf32, #tpu.memory_space<vmem>>, vector<1x128xf32>
    %132 = vector.broadcast %2 : vector<32x1xf32> to vector<32x128xf32>
    %133 = vector.broadcast %131 : vector<1x128xf32> to vector<32x128xf32>
    %134 = arith.mulf %132, %133 : vector<32x128xf32>
    %135 = arith.addf %130, %134 : vector<32x128xf32>
    %c17 = arith.constant 17 : index
    %c0_51 = arith.constant 0 : index
    %136 = vector.load %arg1[%c17, %c0_51] : memref<24x128xf32, #tpu.memory_space<vmem>>, vector<1x128xf32>
    %137 = vector.broadcast %3 : vector<32x1xf32> to vector<32x128xf32>
    %138 = vector.broadcast %136 : vector<1x128xf32> to vector<32x128xf32>
    %139 = arith.mulf %137, %138 : vector<32x128xf32>
    %140 = arith.addf %135, %139 : vector<32x128xf32>
    %141 = vector.broadcast %4 : vector<32x1xf32> to vector<32x128xf32>
    %142 = arith.addf %140, %141 : vector<32x128xf32>
    %cst_52 = arith.constant 0.000000e+00 : f32
    %143 = vector.broadcast %cst_52 : f32 to vector<32x128xf32>
    %144 = arith.maximumf %142, %143 : vector<32x128xf32>
    %145 = arith.truncf %144 : vector<32x128xf32> to vector<32x128xbf16>
    %c160 = arith.constant 160 : index
    %c0_53 = arith.constant 0 : index
    %146 = vector.load %arg5[%c160, %c0_53] : memref<256x128xbf16, #tpu.memory_space<vmem>>, vector<32x128xbf16>
    tpu.vector_store %arg5[%c160, %c0_53], %145 {strides = array<i32>} : memref<256x128xbf16, #tpu.memory_space<vmem>>, vector<32x128xbf16>,
    %147 = arith.extf %145 : vector<32x128xbf16> to vector<32x128xf32>
    %148 = arith.subf %144, %147 : vector<32x128xf32>
    %149 = arith.truncf %148 : vector<32x128xf32> to vector<32x128xbf16>
    %c160_54 = arith.constant 160 : index
    %c0_55 = arith.constant 0 : index
    %150 = vector.load %arg6[%c160_54, %c0_55] : memref<256x128xbf16, #tpu.memory_space<vmem>>, vector<32x128xbf16>
    tpu.vector_store %arg6[%c160_54, %c0_55], %149 {strides = array<i32>} : memref<256x128xbf16, #tpu.memory_space<vmem>>, vector<32x128xbf16>,
    %c18 = arith.constant 18 : index
    %c0_56 = arith.constant 0 : index
    %151 = vector.load %arg1[%c18, %c0_56] : memref<24x128xf32, #tpu.memory_space<vmem>>, vector<1x128xf32>
    %152 = vector.broadcast %1 : vector<32x1xf32> to vector<32x128xf32>
    %153 = vector.broadcast %151 : vector<1x128xf32> to vector<32x128xf32>
    %154 = arith.mulf %152, %153 : vector<32x128xf32>
    %c19 = arith.constant 19 : index
    %c0_57 = arith.constant 0 : index
    %155 = vector.load %arg1[%c19, %c0_57] : memref<24x128xf32, #tpu.memory_space<vmem>>, vector<1x128xf32>
    %156 = vector.broadcast %2 : vector<32x1xf32> to vector<32x128xf32>
    %157 = vector.broadcast %155 : vector<1x128xf32> to vector<32x128xf32>
    %158 = arith.mulf %156, %157 : vector<32x128xf32>
    %159 = arith.addf %154, %158 : vector<32x128xf32>
    %c20 = arith.constant 20 : index
    %c0_58 = arith.constant 0 : index
    %160 = vector.load %arg1[%c20, %c0_58] : memref<24x128xf32, #tpu.memory_space<vmem>>, vector<1x128xf32>
    %161 = vector.broadcast %3 : vector<32x1xf32> to vector<32x128xf32>
    %162 = vector.broadcast %160 : vector<1x128xf32> to vector<32x128xf32>
    %163 = arith.mulf %161, %162 : vector<32x128xf32>
    %164 = arith.addf %159, %163 : vector<32x128xf32>
    %165 = vector.broadcast %4 : vector<32x1xf32> to vector<32x128xf32>
    %166 = arith.addf %164, %165 : vector<32x128xf32>
    %cst_59 = arith.constant 0.000000e+00 : f32
    %167 = vector.broadcast %cst_59 : f32 to vector<32x128xf32>
    %168 = arith.maximumf %166, %167 : vector<32x128xf32>
    %169 = arith.truncf %168 : vector<32x128xf32> to vector<32x128xbf16>
    %c192 = arith.constant 192 : index
    %c0_60 = arith.constant 0 : index
    %170 = vector.load %arg5[%c192, %c0_60] : memref<256x128xbf16, #tpu.memory_space<vmem>>, vector<32x128xbf16>
    tpu.vector_store %arg5[%c192, %c0_60], %169 {strides = array<i32>} : memref<256x128xbf16, #tpu.memory_space<vmem>>, vector<32x128xbf16>,
    %171 = arith.extf %169 : vector<32x128xbf16> to vector<32x128xf32>
    %172 = arith.subf %168, %171 : vector<32x128xf32>
    %173 = arith.truncf %172 : vector<32x128xf32> to vector<32x128xbf16>
    %c192_61 = arith.constant 192 : index
    %c0_62 = arith.constant 0 : index
    %174 = vector.load %arg6[%c192_61, %c0_62] : memref<256x128xbf16, #tpu.memory_space<vmem>>, vector<32x128xbf16>
    tpu.vector_store %arg6[%c192_61, %c0_62], %173 {strides = array<i32>} : memref<256x128xbf16, #tpu.memory_space<vmem>>, vector<32x128xbf16>,
    %c21 = arith.constant 21 : index
    %c0_63 = arith.constant 0 : index
    %175 = vector.load %arg1[%c21, %c0_63] : memref<24x128xf32, #tpu.memory_space<vmem>>, vector<1x128xf32>
    %176 = vector.broadcast %1 : vector<32x1xf32> to vector<32x128xf32>
    %177 = vector.broadcast %175 : vector<1x128xf32> to vector<32x128xf32>
    %178 = arith.mulf %176, %177 : vector<32x128xf32>
    %c22 = arith.constant 22 : index
    %c0_64 = arith.constant 0 : index
    %179 = vector.load %arg1[%c22, %c0_64] : memref<24x128xf32, #tpu.memory_space<vmem>>, vector<1x128xf32>
    %180 = vector.broadcast %2 : vector<32x1xf32> to vector<32x128xf32>
    %181 = vector.broadcast %179 : vector<1x128xf32> to vector<32x128xf32>
    %182 = arith.mulf %180, %181 : vector<32x128xf32>
    %183 = arith.addf %178, %182 : vector<32x128xf32>
    %c23 = arith.constant 23 : index
    %c0_65 = arith.constant 0 : index
    %184 = vector.load %arg1[%c23, %c0_65] : memref<24x128xf32, #tpu.memory_space<vmem>>, vector<1x128xf32>
    %185 = vector.broadcast %3 : vector<32x1xf32> to vector<32x128xf32>
    %186 = vector.broadcast %184 : vector<1x128xf32> to vector<32x128xf32>
    %187 = arith.mulf %185, %186 : vector<32x128xf32>
    %188 = arith.addf %183, %187 : vector<32x128xf32>
    %189 = vector.broadcast %4 : vector<32x1xf32> to vector<32x128xf32>
    %190 = arith.addf %188, %189 : vector<32x128xf32>
    %cst_66 = arith.constant 0.000000e+00 : f32
    %191 = vector.broadcast %cst_66 : f32 to vector<32x128xf32>
    %192 = arith.maximumf %190, %191 : vector<32x128xf32>
    %193 = arith.truncf %192 : vector<32x128xf32> to vector<32x128xbf16>
    %c224 = arith.constant 224 : index
    %c0_67 = arith.constant 0 : index
    %194 = vector.load %arg5[%c224, %c0_67] : memref<256x128xbf16, #tpu.memory_space<vmem>>, vector<32x128xbf16>
    tpu.vector_store %arg5[%c224, %c0_67], %193 {strides = array<i32>} : memref<256x128xbf16, #tpu.memory_space<vmem>>, vector<32x128xbf16>,
    %195 = arith.extf %193 : vector<32x128xbf16> to vector<32x128xf32>
    %196 = arith.subf %192, %195 : vector<32x128xf32>
    %197 = arith.truncf %196 : vector<32x128xf32> to vector<32x128xbf16>
    %c224_68 = arith.constant 224 : index
    %c0_69 = arith.constant 0 : index
    %198 = vector.load %arg6[%c224_68, %c0_69] : memref<256x128xbf16, #tpu.memory_space<vmem>>, vector<32x128xbf16>
    tpu.vector_store %arg6[%c224_68, %c0_69], %197 {strides = array<i32>} : memref<256x128xbf16, #tpu.memory_space<vmem>>, vector<32x128xbf16>,
    %c0_70 = arith.constant 0 : index
    %c0_71 = arith.constant 0 : index
    %199 = vector.load %arg2[%c0_70, %c0_71] : memref<256x512xbf16, #tpu.memory_space<vmem>>, vector<256x256xbf16>
    %c0_72 = arith.constant 0 : index
    %c256 = arith.constant 256 : index
    %200 = vector.load %arg2[%c0_72, %c256] : memref<256x512xbf16, #tpu.memory_space<vmem>>, vector<256x256xbf16>
    %c0_73 = arith.constant 0 : index
    %c0_74 = arith.constant 0 : index
    %201 = vector.load %arg5[%c0_73, %c0_74] : memref<256x128xbf16, #tpu.memory_space<vmem>>, vector<256x128xbf16>
    %c0_75 = arith.constant 0 : index
    %c0_76 = arith.constant 0 : index
    %202 = vector.load %arg6[%c0_75, %c0_76] : memref<256x128xbf16, #tpu.memory_space<vmem>>, vector<256x128xbf16>
    %cst_77 = arith.constant dense<0.000000e+00> : vector<256x128xf32>
    %203 = tpu.matmul %199, %201, %cst_77 {dimension_numbers = #tpu.dot_dimension_numbers<[1], [0], [0], [1], [0, 0, 1, 1], [], []>} : vector<256x256xbf16>, vector<256x128xbf16>, vector<256x128xf32> -> vector<256x128xf32>
    %cst_78 = arith.constant dense<0.000000e+00> : vector<256x128xf32>
    %204 = tpu.matmul %199, %202, %cst_78 {dimension_numbers = #tpu.dot_dimension_numbers<[1], [0], [0], [1], [0, 0, 1, 1], [], []>} : vector<256x256xbf16>, vector<256x128xbf16>, vector<256x128xf32> -> vector<256x128xf32>
    %205 = arith.addf %203, %204 : vector<256x128xf32>
    %cst_79 = arith.constant dense<0.000000e+00> : vector<256x128xf32>
    %206 = tpu.matmul %200, %201, %cst_79 {dimension_numbers = #tpu.dot_dimension_numbers<[1], [0], [0], [1], [0, 0, 1, 1], [], []>} : vector<256x256xbf16>, vector<256x128xbf16>, vector<256x128xf32> -> vector<256x128xf32>
    %207 = arith.addf %205, %206 : vector<256x128xf32>
    %208 = vector.broadcast %0 : vector<256x1xf32> to vector<256x128xf32>
    %209 = arith.addf %207, %208 : vector<256x128xf32>
    %cst_80 = arith.constant 0.000000e+00 : f32
    %210 = vector.broadcast %cst_80 : f32 to vector<256x128xf32>
    %211 = arith.maximumf %209, %210 : vector<256x128xf32>
    %212 = vector.extract_strided_slice %211 {offsets = [0, 0], sizes = [32, 128], strides = [1, 1]} : vector<256x128xf32> to vector<32x128xf32>
    %213 = vector.broadcast %5 : vector<32x1xf32> to vector<32x128xf32>
    %214 = arith.mulf %213, %212 : vector<32x128xf32>
    %cst_81 = arith.constant dense<0.000000e+00> : vector<128xf32>
    %215 = vector.multi_reduction <add>, %214, %cst_81 [0] : vector<32x128xf32> to vector<128xf32>
    %216 = vector.shape_cast %215 : vector<128xf32> to vector<1x128xf32>
    %217 = vector.broadcast %6 : vector<1x1xf32> to vector<1x128xf32>
    %218 = arith.addf %216, %217 : vector<1x128xf32>
    %c0_82 = arith.constant 0 : index
    %c0_83 = arith.constant 0 : index
    %219 = vector.load %arg4[%c0_82, %c0_83] : memref<8x128xf32, #tpu.memory_space<vmem>>, vector<1x128xf32>
    tpu.vector_store %arg4[%c0_82, %c0_83], %218 {strides = array<i32>} : memref<8x128xf32, #tpu.memory_space<vmem>>, vector<1x128xf32>,
    %220 = vector.extract_strided_slice %211 {offsets = [32, 0], sizes = [32, 128], strides = [1, 1]} : vector<256x128xf32> to vector<32x128xf32>
    %221 = vector.broadcast %5 : vector<32x1xf32> to vector<32x128xf32>
    %222 = arith.mulf %221, %220 : vector<32x128xf32>
    %cst_84 = arith.constant dense<0.000000e+00> : vector<128xf32>
    %223 = vector.multi_reduction <add>, %222, %cst_84 [0] : vector<32x128xf32> to vector<128xf32>
    %224 = vector.shape_cast %223 : vector<128xf32> to vector<1x128xf32>
    %225 = vector.broadcast %6 : vector<1x1xf32> to vector<1x128xf32>
    %226 = arith.addf %224, %225 : vector<1x128xf32>
    %c1_85 = arith.constant 1 : index
    %c0_86 = arith.constant 0 : index
    %227 = vector.load %arg4[%c1_85, %c0_86] : memref<8x128xf32, #tpu.memory_space<vmem>>, vector<1x128xf32>
    tpu.vector_store %arg4[%c1_85, %c0_86], %226 {strides = array<i32>} : memref<8x128xf32, #tpu.memory_space<vmem>>, vector<1x128xf32>,
    %228 = vector.extract_strided_slice %211 {offsets = [64, 0], sizes = [32, 128], strides = [1, 1]} : vector<256x128xf32> to vector<32x128xf32>
    %229 = vector.broadcast %5 : vector<32x1xf32> to vector<32x128xf32>
    %230 = arith.mulf %229, %228 : vector<32x128xf32>
    %cst_87 = arith.constant dense<0.000000e+00> : vector<128xf32>
    %231 = vector.multi_reduction <add>, %230, %cst_87 [0] : vector<32x128xf32> to vector<128xf32>
    %232 = vector.shape_cast %231 : vector<128xf32> to vector<1x128xf32>
    %233 = vector.broadcast %6 : vector<1x1xf32> to vector<1x128xf32>
    %234 = arith.addf %232, %233 : vector<1x128xf32>
    %c2_88 = arith.constant 2 : index
    %c0_89 = arith.constant 0 : index
    %235 = vector.load %arg4[%c2_88, %c0_89] : memref<8x128xf32, #tpu.memory_space<vmem>>, vector<1x128xf32>
    tpu.vector_store %arg4[%c2_88, %c0_89], %234 {strides = array<i32>} : memref<8x128xf32, #tpu.memory_space<vmem>>, vector<1x128xf32>,
    %236 = vector.extract_strided_slice %211 {offsets = [96, 0], sizes = [32, 128], strides = [1, 1]} : vector<256x128xf32> to vector<32x128xf32>
    %237 = vector.broadcast %5 : vector<32x1xf32> to vector<32x128xf32>
    %238 = arith.mulf %237, %236 : vector<32x128xf32>
    %cst_90 = arith.constant dense<0.000000e+00> : vector<128xf32>
    %239 = vector.multi_reduction <add>, %238, %cst_90 [0] : vector<32x128xf32> to vector<128xf32>
    %240 = vector.shape_cast %239 : vector<128xf32> to vector<1x128xf32>
    %241 = vector.broadcast %6 : vector<1x1xf32> to vector<1x128xf32>
    %242 = arith.addf %240, %241 : vector<1x128xf32>
    %c3_91 = arith.constant 3 : index
    %c0_92 = arith.constant 0 : index
    %243 = vector.load %arg4[%c3_91, %c0_92] : memref<8x128xf32, #tpu.memory_space<vmem>>, vector<1x128xf32>
    tpu.vector_store %arg4[%c3_91, %c0_92], %242 {strides = array<i32>} : memref<8x128xf32, #tpu.memory_space<vmem>>, vector<1x128xf32>,
    %244 = vector.extract_strided_slice %211 {offsets = [128, 0], sizes = [32, 128], strides = [1, 1]} : vector<256x128xf32> to vector<32x128xf32>
    %245 = vector.broadcast %5 : vector<32x1xf32> to vector<32x128xf32>
    %246 = arith.mulf %245, %244 : vector<32x128xf32>
    %cst_93 = arith.constant dense<0.000000e+00> : vector<128xf32>
    %247 = vector.multi_reduction <add>, %246, %cst_93 [0] : vector<32x128xf32> to vector<128xf32>
    %248 = vector.shape_cast %247 : vector<128xf32> to vector<1x128xf32>
    %249 = vector.broadcast %6 : vector<1x1xf32> to vector<1x128xf32>
    %250 = arith.addf %248, %249 : vector<1x128xf32>
    %c4_94 = arith.constant 4 : index
    %c0_95 = arith.constant 0 : index
    %251 = vector.load %arg4[%c4_94, %c0_95] : memref<8x128xf32, #tpu.memory_space<vmem>>, vector<1x128xf32>
    tpu.vector_store %arg4[%c4_94, %c0_95], %250 {strides = array<i32>} : memref<8x128xf32, #tpu.memory_space<vmem>>, vector<1x128xf32>,
    %252 = vector.extract_strided_slice %211 {offsets = [160, 0], sizes = [32, 128], strides = [1, 1]} : vector<256x128xf32> to vector<32x128xf32>
    %253 = vector.broadcast %5 : vector<32x1xf32> to vector<32x128xf32>
    %254 = arith.mulf %253, %252 : vector<32x128xf32>
    %cst_96 = arith.constant dense<0.000000e+00> : vector<128xf32>
    %255 = vector.multi_reduction <add>, %254, %cst_96 [0] : vector<32x128xf32> to vector<128xf32>
    %256 = vector.shape_cast %255 : vector<128xf32> to vector<1x128xf32>
    %257 = vector.broadcast %6 : vector<1x1xf32> to vector<1x128xf32>
    %258 = arith.addf %256, %257 : vector<1x128xf32>
    %c5_97 = arith.constant 5 : index
    %c0_98 = arith.constant 0 : index
    %259 = vector.load %arg4[%c5_97, %c0_98] : memref<8x128xf32, #tpu.memory_space<vmem>>, vector<1x128xf32>
    tpu.vector_store %arg4[%c5_97, %c0_98], %258 {strides = array<i32>} : memref<8x128xf32, #tpu.memory_space<vmem>>, vector<1x128xf32>,
    %260 = vector.extract_strided_slice %211 {offsets = [192, 0], sizes = [32, 128], strides = [1, 1]} : vector<256x128xf32> to vector<32x128xf32>
    %261 = vector.broadcast %5 : vector<32x1xf32> to vector<32x128xf32>
    %262 = arith.mulf %261, %260 : vector<32x128xf32>
    %cst_99 = arith.constant dense<0.000000e+00> : vector<128xf32>
    %263 = vector.multi_reduction <add>, %262, %cst_99 [0] : vector<32x128xf32> to vector<128xf32>
    %264 = vector.shape_cast %263 : vector<128xf32> to vector<1x128xf32>
    %265 = vector.broadcast %6 : vector<1x1xf32> to vector<1x128xf32>
    %266 = arith.addf %264, %265 : vector<1x128xf32>
    %c6_100 = arith.constant 6 : index
    %c0_101 = arith.constant 0 : index
    %267 = vector.load %arg4[%c6_100, %c0_101] : memref<8x128xf32, #tpu.memory_space<vmem>>, vector<1x128xf32>
    tpu.vector_store %arg4[%c6_100, %c0_101], %266 {strides = array<i32>} : memref<8x128xf32, #tpu.memory_space<vmem>>, vector<1x128xf32>,
    %268 = vector.extract_strided_slice %211 {offsets = [224, 0], sizes = [32, 128], strides = [1, 1]} : vector<256x128xf32> to vector<32x128xf32>
    %269 = vector.broadcast %5 : vector<32x1xf32> to vector<32x128xf32>
    %270 = arith.mulf %269, %268 : vector<32x128xf32>
    %cst_102 = arith.constant dense<0.000000e+00> : vector<128xf32>
    %271 = vector.multi_reduction <add>, %270, %cst_102 [0] : vector<32x128xf32> to vector<128xf32>
    %272 = vector.shape_cast %271 : vector<128xf32> to vector<1x128xf32>
    %273 = vector.broadcast %6 : vector<1x1xf32> to vector<1x128xf32>
    %274 = arith.addf %272, %273 : vector<1x128xf32>
    %c7_103 = arith.constant 7 : index
    %c0_104 = arith.constant 0 : index
    %275 = vector.load %arg4[%c7_103, %c0_104] : memref<8x128xf32, #tpu.memory_space<vmem>>, vector<1x128xf32>
    tpu.vector_store %arg4[%c7_103, %c0_104], %274 {strides = array<i32>} : memref<8x128xf32, #tpu.memory_space<vmem>>, vector<1x128xf32>,
    return
  }
  func.func @transform_0(%arg0: i32) -> (i32, i32) {
    %c0_i32 = arith.constant 0 : i32
    %c0_i32_0 = arith.constant 0 : i32
    return %c0_i32, %arg0 : i32, i32
  }
  func.func @transform_1(%arg0: i32) -> (i32, i32) {
    %c0_i32 = arith.constant 0 : i32
    %c0_i32_0 = arith.constant 0 : i32
    %c0_i32_1 = arith.constant 0 : i32
    return %c0_i32, %c0_i32_0 : i32, i32
  }
  func.func @transform_2(%arg0: i32) -> (i32, i32) {
    %c0_i32 = arith.constant 0 : i32
    %c0_i32_0 = arith.constant 0 : i32
    %c0_i32_1 = arith.constant 0 : i32
    return %c0_i32, %c0_i32_0 : i32, i32
  }
  func.func @transform_3(%arg0: i32) -> (i32, i32) {
    %c0_i32 = arith.constant 0 : i32
    %c0_i32_0 = arith.constant 0 : i32
    return %c0_i32, %arg0 : i32, i32
  }
}

</mosaic_0001>

<bundles_post_ra>
// kernel: tpu_custom_call.1
= control target key start
LH: loop header
LB: loop body
LE: loop exit
PB: predicated region body
PF: predicated region fallthrough
CT: control target
= control target key end

     0   :  { %8 = vsyncpa [#allocation5], 0  ;;  %s3680_s0 = inlined_call_operand.vmem [shape: f32[24,128], index: 0, kind: input, shape index: {}]   ;;  %s3681_s1 = inlined_call_operand.hbm [shape: bf16[256,512], index: 1, kind: input, shape index: {}]   ;;  %s3682_s2 = inlined_call_operand.vmem [shape: f32[256,7], index: 2, kind: input, shape index: {}]   ;;  %s3683_s3 = inlined_call_operand.hbm [shape: f32[8,128], index: 3, kind: output, shape index: {}]  }
   0x1   :  { %9 = vsyncpa [#allocation6], 0  ;;  %s2525_s12 = smov [#allocation4]   ;;  %s2477_s16 = scalar_lea.hbm %s3681_s1, 8192 }
   0x2   :  { %s17_s13 = sshll.u32 %s2525_s12, 4  ;;  %p2478_p0 = scmp.ne.s32.totalorder %s3681_s1, %s2477_s16  ;;  %s18_s13 = int_to_ptr.vmem [resolvable:$true] %s17_s13 }
   0x3   :  { %p2481_p1 = scmp.lt.u32.totalorder %s2477_s16, %s3681_s1 }
   0x5   :  { %p2483_p2 = pnand %p2481_p1, %p2478_p0 }
   0x7   :  { %2486 = shalt.err (!%p2483_p2)
}
   0x8   :  { %s2487_s21 = scalar_lea.vmem %s18_s13, 8192  ;;  %p2492_p4 = scmp.lt.s32.totalorder %s18_s13, %s18_s13 }
   0x9   :  { %p2488_p3 = scmp.ne.s32.totalorder %s18_s13, %s2487_s21  ;;  %p2493_p5 = scmp.lt.s32.totalorder %s2487_s21, %s2487_s21 }
   0xb   :  { %p2494_p6 = por %p2493_p5, %p2492_p4 }
   0xd   :  { %p2495_p7 = pnand %p2494_p6, %p2488_p3 }
   0xf   :  { %2498 = shalt.err (!%p2495_p7)
}
  0x10   :  { %s2526_s22 = smov 256   ;;  %s2527_s23 = smov 16  }
  0x11   :  { %23 = dma.hbm_to_vmem [thread:$0]  %s3681_s1, 8192, %s18_s13, [#allocation5], %s2526_s22, %s2526_s22, %s2527_s23  }
  0x12   :  { %2521 = dma.done.wait [#allocation5], 8192  }
  0x13   :  { %2522 = vsyncadd [#allocation5], 4294959104  ;;  %v2528_v0 = vmov 2   ;;  %v2529_v1 = vmov 1   ;;  %v2571_v2 = vld [vmem:[%s3682_s2] sm:$0xff]  ;;  %v2578_v3 = vld [vmem:[%s3682_s2 + $0x8] sm:$0xff] }
  0x14   :  { %2362 = vset.pattern.permute.xlu1 %v2528_v0  ;;  %2361 = vset.pattern.permute.xlu0 %v2529_v1  ;;  %3701 = vst [vmem:[#allocation10_spill] sm:$0xff] %v2571_v2  ;;  %3702 = vst [vmem:[#allocation11_spill] sm:$0xff] %v2578_v3  ;;  %v2583_v4 = vld [vmem:[%s3682_s2 + $0x18] sm:$0xff]  ;;  %v2530_v5 = vmov 3   ;;  %v2592_v6 = vld [vmem:[%s3682_s2 + $0x10] sm:$0xff]  ;;  %v2531_v7 = vmov 4  }
  0x15   :  { %94 = vperm.xlu1 %2362, %v2571_v2   ;;  %66 = vperm.xlu0 %2361, %v2571_v2   ;;  %3703 = vst [vmem:[#allocation12_spill] sm:$0xff] %v2583_v4  ;;  %3704 = vst [vmem:[#allocation13_spill] sm:$0xff] %v2592_v6  ;;  %v2377_v8 = vld [vmem:[#allocation4 + $0x4] ss:$16 sps:$4 sm:$0xff]   ;;  %v2607_v10 = vld [vmem:[%s3680_s0 + $0xc] ss:$0 sm:$0xff] }
  0x16   :  { %v2380_v9 = vld [vmem:[#allocation4 + $0x104] ss:$16 sps:$4 sm:$0xff]   ;;  %891 = vmatprep.mubr.bf16.mxu0 %v2377_v8  ;;  %v2612_v11 = vld [vmem:[%s3680_s0 + $0xd] ss:$0 sm:$0xff]  ;;  %v2617_v12 = vld [vmem:[%s3680_s0] ss:$0 sm:$0xff] }
  0x17   :  { %955 = vmatprep.mubr.bf16.mxu1 %v2380_v9  ;;  %v2622_v13 = vld [vmem:[%s3680_s0 + $0x1] ss:$0 sm:$0xff]  ;;  %v2627_v14 = vld [vmem:[%s3680_s0 + $0xf] ss:$0 sm:$0xff]  ;;  %v2632_v15 = vld [vmem:[%s3680_s0 + $0x10] ss:$0 sm:$0xff] }
  0x18   :  { %v2637_v16 = vld [vmem:[%s3680_s0 + $0x3] ss:$0 sm:$0xff]  ;;  %v2642_v17 = vld [vmem:[%s3680_s0 + $0x4] ss:$0 sm:$0xff]  ;;  %v2651_v20 = vld [vmem:[%s3680_s0 + $0x12] ss:$0 sm:$0xff] }
  0x19   :  { %98 = vperm.xlu1 %2362, %v2578_v3   ;;  %71 = vperm.xlu0 %2361, %v2578_v3   ;;  %v2656_v21 = vld [vmem:[%s3680_s0 + $0x13] ss:$0 sm:$0xff]  ;;  %v2669_v26 = vld [vmem:[%s3680_s0 + $0x6] ss:$0 sm:$0xff]  ;;  %v2674_v27 = vld [vmem:[%s3680_s0 + $0x7] ss:$0 sm:$0xff] }
  0x1a   :  { %v2711_v46 = vld [vmem:[%s3680_s0 + $0xe] ss:$0 sm:$0xff]  ;;  %v2724_v53 = vld [vmem:[%s3680_s0 + $0x2] ss:$0 sm:$0xff]  ;;  %v2729_v54 = vld [vmem:[%s3680_s0 + $0x11] ss:$0 sm:$0xff] }
  0x1b   :  { %v2734_v55 = vld [vmem:[%s3680_s0 + $0x5] ss:$0 sm:$0xff]  ;;  %v2745_v62 = vld [vmem:[%s3680_s0 + $0x14] ss:$0 sm:$0xff] }
  0x1d   :  { %2363 = vset.pattern.permute.xlu1 %v2530_v5  ;;  %81 = vperm.xlu0 %2361, %v2583_v4  }
  0x1e   :  { %127 = vperm.xlu1 %2363, %v2578_v3  }
  0x21   :  { %2365 = vset.pattern.permute.xlu0 %v2530_v5 }
  0x22   :  { %2364 = vset.pattern.permute.xlu1 %v2529_v1  ;;  %123 = vperm.xlu0 %2365, %v2571_v2  }
  0x23   :  { %76 = vperm.xlu1 %2364, %v2592_v6  }
  0x26   :  { %131 = vperm.xlu0 %2365, %v2592_v6  }
  0x27   :  { %2366 = vset.pattern.permute.xlu1 %v2528_v0 }
  0x28   :  { %102 = vperm.xlu1 %2366, %v2592_v6  }
  0x2a   :  { %2369 = vset.pattern.permute.xlu0 %v2531_v7 }
  0x2b   :  { %155 = vperm.xlu0 %2369, %v2578_v3  }
  0x2c   :  { %106 = vperm.xlu1 %2366, %v2583_v4  }
  0x30   :  { %2367 = vset.pattern.permute.xlu1 %v2530_v5 }
  0x31   :  { %135 = vperm.xlu1 %2367, %v2583_v4  }
  0x35   :  { %2368 = vset.pattern.permute.xlu1 %v2531_v7 }
  0x36   :  { %151 = vperm.xlu1 %2368, %v2571_v2  }
  0x3a   :  { %159 = vperm.xlu1 %2368, %v2592_v6  }
  0x3e   :  { %163 = vperm.xlu1 %2368, %v2583_v4  }
  0x94   :  { %v2644_v18 = vpop.permute.xlu1 %94  ;;  %v2646_v19 = vpop.permute.xlu0 %66 }
  0x95   :  { %v372_v22 = vmul.f32 %v2607_v10, %v2646_v19  ;;  %v381_v23 = vmul.f32 %v2612_v11, %v2644_v18  ;;  %v88_v24 = vmul.f32 %v2617_v12, %v2646_v19  ;;  %v113_v25 = vmul.f32 %v2622_v13, %v2644_v18 }
  0x96   :  { %v431_v28 = vmul.f32 %v2627_v14, %v2646_v19  ;;  %v440_v29 = vmul.f32 %v2632_v15, %v2644_v18  ;;  %v195_v30 = vmul.f32 %v2637_v16, %v2646_v19  ;;  %v204_v31 = vmul.f32 %v2642_v17, %v2644_v18 }
  0x97   :  { %v2684_v32 = vadd.f32 %v381_v23, %v372_v22  ;;  %v2686_v33 = vadd.f32 %v113_v25, %v88_v24  ;;  %v490_v34 = vmul.f32 %v2651_v20, %v2646_v19  ;;  %v499_v35 = vmul.f32 %v2656_v21, %v2644_v18  ;;  %v2778_v25 = vld [vmem:[%s3680_s0 + $0x8] ss:$0 sm:$0xff] }
  0x98   :  { %v2692_v36 = vpop.permute.xlu1 %98  ;;  %v2694_v37 = vpop.permute.xlu0 %71  ;;  %v444_v38 = vadd.f32 %v440_v29, %v431_v28  ;;  %v208_v39 = vadd.f32 %v204_v31, %v195_v30  ;;  %v254_v40 = vmul.f32 %v2669_v26, %v2646_v19  ;;  %v263_v41 = vmul.f32 %v2674_v27, %v2644_v18 }
  0x99   :  { %v373_v42 = vmul.f32 %v2607_v10, %v2694_v37  ;;  %v382_v43 = vmul.f32 %v2612_v11, %v2692_v36  ;;  %v89_v44 = vmul.f32 %v2617_v12, %v2694_v37  ;;  %v114_v45 = vmul.f32 %v2622_v13, %v2692_v36 }
  0x9a   :  { %v432_v47 = vmul.f32 %v2627_v14, %v2694_v37  ;;  %v441_v48 = vmul.f32 %v2632_v15, %v2692_v36  ;;  %v196_v49 = vmul.f32 %v2637_v16, %v2694_v37  ;;  %v205_v50 = vmul.f32 %v2642_v17, %v2692_v36 }
  0x9b   :  { %v386_v51 = vadd.f32 %v382_v43, %v373_v42  ;;  %v118_v52 = vadd.f32 %v114_v45, %v89_v44  ;;  %v491_v56 = vmul.f32 %v2651_v20, %v2694_v37  ;;  %v500_v57 = vmul.f32 %v2656_v21, %v2692_v36 }
  0x9c   :  { %v2740_v58 = vpop.permute.xlu0 %81  ;;  %v445_v59 = vadd.f32 %v441_v48, %v432_v47  ;;  %v209_v60 = vadd.f32 %v205_v50, %v196_v49  ;;  %v503_v61 = vadd.f32 %v499_v35, %v490_v34  ;;  %v255_v63 = vmul.f32 %v2669_v26, %v2694_v37 }
  0x9d   :  { %v2749_v0 = vpop.permute.xlu1 %127  ;;  %v2753_v1 = vmul.f32 %v2607_v10, %v2740_v58  ;;  %v2757_v5 = vmul.f32 %v2617_v12, %v2740_v58  ;;  %v2761_v7 = vmul.f32 %v2627_v14, %v2740_v58  ;;  %v2765_v8 = vmul.f32 %v2637_v16, %v2740_v58 }
  0x9e   :  { %3705 = vst [vmem:[#allocation14_spill] sm:$0xff] %v2749_v0  ;;  %v395_v9 = vmul.f32 %v2711_v46, %v2749_v0  ;;  %v143_v22 = vmul.f32 %v2724_v53, %v2749_v0  ;;  %v454_v23 = vmul.f32 %v2729_v54, %v2749_v0  ;;  %v218_v24 = vmul.f32 %v2734_v55, %v2749_v0 }
  0x9f   :  { %v504_v28 = vadd.f32 %v500_v57, %v491_v56  ;;  %v513_v29 = vmul.f32 %v2745_v62, %v2749_v0  ;;  %v264_v30 = vmul.f32 %v2674_v27, %v2692_v36  ;;  %v267_v31 = vadd.f32 %v263_v41, %v254_v40 }
  0xa0   :  { %v399_v34 = vadd.f32 %v395_v9, %v386_v51  ;;  %v147_v35 = vadd.f32 %v143_v22, %v118_v52  ;;  %v458_v42 = vadd.f32 %v454_v23, %v445_v59  ;;  %v222_v43 = vadd.f32 %v218_v24, %v209_v60 }
  0xa1   :  { %v2784_v44 = vpop.permute.xlu0 %123  ;;  %v2786_v45 = vadd.f32 %v513_v29, %v504_v28  ;;  %v268_v47 = vadd.f32 %v264_v30, %v255_v63  ;;  %v277_v48 = vmul.f32 %v2778_v25, %v2749_v0  ;;  %v2792_v49 = vmul.f32 %v2651_v20, %v2740_v58 }
  0xa2   :  { %3706 = vst [vmem:[#allocation15_spill] sm:$0xff] %v2784_v44  ;;  %v2794_v50 = vpop.permute.xlu1 %76  ;;  %v394_v40 = vmul.f32 %v2711_v46, %v2784_v44  ;;  %v142_v41 = vmul.f32 %v2724_v53, %v2784_v44  ;;  %v453_v51 = vmul.f32 %v2729_v54, %v2784_v44  ;;  %v217_v52 = vmul.f32 %v2734_v55, %v2784_v44 }
  0xa3   :  { %3707 = vst [vmem:[#allocation16_spill] sm:$0xff] %v2794_v50  ;;  %v374_v56 = vmul.f32 %v2607_v10, %v2794_v50  ;;  %v90_v57 = vmul.f32 %v2617_v12, %v2794_v50  ;;  %v433_v59 = vmul.f32 %v2627_v14, %v2794_v50  ;;  %v197_v60 = vmul.f32 %v2637_v16, %v2794_v50 }
  0xa4   :  { %v2813_v63 = vadd.f32 %v394_v40, %v2684_v32  ;;  %v2816_v9 = vadd.f32 %v142_v41, %v2686_v33  ;;  %v2818_v22 = vadd.f32 %v453_v51, %v444_v38  ;;  %v2820_v23 = vadd.f32 %v217_v52, %v208_v39 }
  0xa5   :  { %v2822_v10 = vpop.permute.xlu0 %131  ;;  %v512_v12 = vmul.f32 %v2745_v62, %v2784_v44  ;;  %v276_v14 = vmul.f32 %v2778_v25, %v2784_v44  ;;  %v281_v24 = vadd.f32 %v277_v48, %v268_v47  ;;  %v492_v16 = vmul.f32 %v2651_v20, %v2794_v50 }
  0xa6   :  { %v396_v32 = vmul.f32 %v2711_v46, %v2822_v10  ;;  %v144_v33 = vmul.f32 %v2724_v53, %v2822_v10  ;;  %v455_v38 = vmul.f32 %v2729_v54, %v2822_v10  ;;  %v219_v39 = vmul.f32 %v2734_v55, %v2822_v10 }
  0xa7   :  { %v2838_v28 = vpop.permute.xlu1 %102  ;;  %v2840_v29 = vadd.f32 %v512_v12, %v503_v61  ;;  %v2842_v30 = vadd.f32 %v276_v14, %v267_v31  ;;  %v514_v20 = vmul.f32 %v2745_v62, %v2822_v10  ;;  %v256_v47 = vmul.f32 %v2669_v26, %v2794_v50 }
  0xa8   :  { %3708 = vst [vmem:[#allocation17_spill] sm:$0xff] %v2838_v28  ;;  %v383_v48 = vmul.f32 %v2612_v11, %v2838_v28  ;;  %v115_v40 = vmul.f32 %v2622_v13, %v2838_v28  ;;  %v442_v41 = vmul.f32 %v2632_v15, %v2838_v28  ;;  %v206_v61 = vmul.f32 %v2642_v17, %v2838_v28 }
  0xa9   :  { %v501_v31 = vmul.f32 %v2656_v21, %v2838_v28  ;;  %v257_v51 = vmul.f32 %v2669_v26, %v2740_v58  ;;  %v265_v52 = vmul.f32 %v2674_v27, %v2838_v28  ;;  %v278_v12 = vmul.f32 %v2778_v25, %v2822_v10 }
  0xaa   :  { %v2864_v14 = vpop.permute.xlu0 %155  ;;  %v387_v50 = vadd.f32 %v383_v48, %v374_v56  ;;  %v119_v4 = vadd.f32 %v115_v40, %v90_v57  ;;  %v446_v6 = vadd.f32 %v442_v41, %v433_v59  ;;  %v210_v2 = vadd.f32 %v206_v61, %v197_v60 }
  0xab   :  { %v2866_v3 = vpop.permute.xlu1 %106  ;;  %v2869_v0 = vadd.f32 %v399_v34, %v2864_v14  ;;  %v2872_v44 = vadd.f32 %v2864_v14, %v147_v35  ;;  %v2875_v26 = vadd.f32 %v458_v42, %v2864_v14  ;;  %v2878_v28 = vadd.f32 %v222_v43, %v2864_v14 }
  0xac   :  { %v384_v56 = vmul.f32 %v2612_v11, %v2866_v3  ;;  %v400_v57 = vadd.f32 %v396_v32, %v387_v50  ;;  %v116_v59 = vmul.f32 %v2622_v13, %v2866_v3  ;;  %v148_v60 = vadd.f32 %v144_v33, %v119_v4 }
  0xad   :  { %v407_v34 = vmax.f32 %v2869_v0, 0.0  ;;  %v171_v48 = vmax.f32 %v2872_v44, 0.0  ;;  %v466_v35 = vmax.f32 %v2875_v26, 0.0  ;;  %v3696_v42 = vmax.f32 %v2878_v28, 0.0 }
  0xae   :  { %v388_v40 = vadd.f32 %v384_v56, %v2753_v1  ;;  %v120_v43 = vadd.f32 %v116_v59, %v2757_v5  ;;  %v443_v11 = vmul.f32 %v2632_v15, %v2866_v3  ;;  %v459_v50 = vadd.f32 %v455_v38, %v446_v6 }
  0xaf   :  { %v207_v13 = vmul.f32 %v2642_v17, %v2866_v3  ;;  %v223_v4 = vadd.f32 %v219_v39, %v210_v2  ;;  %v2896_v32 = vadd.f32 %v2786_v45, %v2864_v14  ;;  %v2899_v33 = vadd.f32 %v281_v24, %v2864_v14 }
  0xb0   :  { %v2901_v41 = vpop.permute.xlu1 %135  ;;  %v447_v1 = vadd.f32 %v443_v11, %v2761_v7  ;;  %v502_v5 = vmul.f32 %v2656_v21, %v2866_v3  ;;  %v505_v15 = vadd.f32 %v501_v31, %v492_v16  ;;  %v266_v6 = vmul.f32 %v2674_v27, %v2866_v3 }
  0xb1   :  { %v397_v2 = vmul.f32 %v2711_v46, %v2901_v41  ;;  %v145_v17 = vmul.f32 %v2724_v53, %v2901_v41  ;;  %v456_v45 = vmul.f32 %v2729_v54, %v2901_v41  ;;  %v211_v24 = vadd.f32 %v207_v13, %v2765_v8  ;;  %v2923_v46 = vld [vmem:[%s3680_s0 + $0x15] ss:$0 sm:$0xff] }
  0xb2   :  { %v220_v7 = vmul.f32 %v2734_v55, %v2901_v41  ;;  %v506_v27 = vadd.f32 %v502_v5, %v2792_v49  ;;  %v515_v54 = vmul.f32 %v2745_v62, %v2901_v41  ;;  %v2929_v55 = vadd.f32 %v514_v20, %v505_v15 }
  0xb3   :  { %v401_v53 = vadd.f32 %v397_v2, %v388_v40  ;;  %v149_v38 = vadd.f32 %v145_v17, %v120_v43  ;;  %v460_v39 = vadd.f32 %v456_v45, %v447_v1  ;;  %v269_v61 = vadd.f32 %v265_v52, %v256_v47  ;;  %v2956_v52 = vld [vmem:[%s3680_s0 + $0x16] ss:$0 sm:$0xff] }
  0xb4   :  { %v2927_v8 = vadd.f32 %v220_v7, %v211_v24  ;;  %v270_v31 = vadd.f32 %v266_v6, %v257_v51  ;;  %v2933_v49 = vadd.f32 %v515_v54, %v506_v27  ;;  %v279_v59 = vmul.f32 %v2778_v25, %v2901_v41 }
  0xb5   :  { %v2931_v56 = vpop.permute.xlu1 %151  ;;  %v2939_v40 = vmul.f32 %v2923_v46, %v2646_v19  ;;  %v2943_v62 = vmul.f32 %v2923_v46, %v2694_v37 }
  0xb6   :  { %v402_v20 = vadd.f32 %v2813_v63, %v2931_v56  ;;  %v166_v47 = vadd.f32 %v2931_v56, %v2816_v9  ;;  %v461_v51 = vadd.f32 %v2818_v22, %v2931_v56  ;;  %v225_v25 = vadd.f32 %v2820_v23, %v2931_v56 }
  0xb7   :  { %v2960_v43 = vadd.f32 %v2840_v29, %v2931_v56  ;;  %v2964_v63 = vadd.f32 %v2842_v30, %v2931_v56  ;;  %v2966_v9 = vadd.f32 %v278_v12, %v269_v61  ;;  %v2968_v11 = vadd.f32 %v279_v59, %v270_v31 }
  0xb8   :  { %v406_v22 = vmax.f32 %v402_v20, 0.0  ;;  %v170_v13 = vmax.f32 %v166_v47, 0.0  ;;  %v465_v23 = vmax.f32 %v461_v51, 0.0  ;;  %v229_v1 = vmax.f32 %v225_v25, 0.0 }
  0xb9   :  { %v2970_v5 = vpop.permute.xlu1 %159  ;;  %v2976_v29 = vmul.f32 %v2956_v52, %v2644_v18  ;;  %v2980_v30 = vmul.f32 %v2956_v52, %v2692_v36 }
  0xba   :  { %v2984_v12 = vpack.c.bf16 %v407_v34, %v406_v22  ;;  %v2988_v2 = vpack.c.bf16 %v171_v48, %v170_v13  ;;  %v404_v17 = vadd.f32 %v400_v57, %v2970_v5  ;;  %v168_v45 = vadd.f32 %v2970_v5, %v148_v60 }
  0xbb   :  { %v2994_v24 = vpack.c.bf16 %v466_v35, %v465_v23  ;;  %v2998_v7 = vpack.c.bf16 %v3696_v42, %v229_v1  ;;  %v3001_v27 = vadd.f32 %v459_v50, %v2970_v5  ;;  %v3004_v54 = vadd.f32 %v223_v4, %v2970_v5 }
  0xbc   :  { %3709 = vst [vmem:[#allocation18_spill] sm:$0xff] %v2988_v2  ;;  %v414_v61 = vunpack.c.l.bf16 %v2984_v12  ;;  %v415_v57 = vunpack.c.h.bf16 %v2984_v12  ;;  %v178_v60 = vunpack.c.l.bf16 %v2988_v2  ;;  %v179_v31 = vunpack.c.h.bf16 %v2988_v2 }
  0xbd   :  { %3710 = vst [vmem:[#allocation19_spill] sm:$0xff] %v2994_v24  ;;  %v3010_v59 = vpop.permute.xlu1 %163  ;;  %v408_v20 = vmax.f32 %v404_v17, 0.0  ;;  %v172_v47 = vmax.f32 %v168_v45, 0.0  ;;  %v473_v51 = vunpack.c.l.bf16 %v2994_v24  ;;  %v474_v50 = vunpack.c.h.bf16 %v2994_v24 }
  0xbe   :  { %v418_v25 = vsub.f32 %v406_v22, %v414_v61  ;;  %v419_v4 = vsub.f32 %v407_v34, %v415_v57  ;;  %v182_v16 = vsub.f32 %v170_v13, %v178_v60  ;;  %v183_v6 = vsub.f32 %v171_v48, %v179_v31 }
  0xbf   :  { %v405_v21 = vadd.f32 %v401_v53, %v3010_v59  ;;  %v169_v15 = vadd.f32 %v3010_v59, %v149_v38  ;;  %v477_v42 = vsub.f32 %v465_v23, %v473_v51  ;;  %v478_v17 = vsub.f32 %v466_v35, %v474_v50 }
  0xc0   :  { %v422_v45 = vpack.c.bf16 %v419_v4, %v418_v25  ;;  %v186_v2 = vpack.c.bf16 %v183_v6, %v182_v16  ;;  %v237_v24 = vunpack.c.l.bf16 %v2998_v7  ;;  %v238_v22 = vunpack.c.h.bf16 %v2998_v7 }
  0xc1   :  { %v409_v0 = vmax.f32 %v405_v21, 0.0  ;;  %v173_v34 = vmax.f32 %v169_v15, 0.0  ;;  %v481_v13 = vpack.c.bf16 %v478_v17, %v477_v42  ;;  %v464_v44 = vadd.f32 %v460_v39, %v3010_v59 }
  0xc2   :  { %1998 = vmatprep.subr.bf16.mxu0 %v422_v45  ;;  %2334 = vmatprep.subr.bf16.mxu1 %v422_v45  ;;  %v241_v48 = vsub.f32 %v229_v1, %v237_v24  ;;  %v3711_v53 = vmax.f32 %v2878_v28, 0.0  ;;  %v467_v26 = vmax.f32 %v3001_v27, 0.0  ;;  %v228_v35 = vadd.f32 %v2927_v8, %v3010_v59 }
  0xc3   :  { %1999 = vmatpush3.bf16.msra.mxu0 %v186_v2  ;;  %2342 = vmatpush3.bf16.msra.mxu1 %v186_v2  ;;  %v3030_v16 = vpack.c.bf16 %v409_v0, %v408_v20  ;;  %v3032_v21 = vpack.c.bf16 %v173_v34, %v172_v47  ;;  %v468_v42 = vmax.f32 %v464_v44, 0.0  ;;  %v231_v39 = vmax.f32 %v3004_v54, 0.0 }
  0xc4   :  { %v242_v38 = vsub.f32 %v3711_v53, %v238_v22  ;;  %v232_v15 = vmax.f32 %v228_v35, 0.0  ;;  %v3712_v1 = vmax.f32 %v2960_v43, 0.0  ;;  %v3713_v28 = vmax.f32 %v2896_v32, 0.0 }
  0xc5   :  { %v3714_v24 = vmax.f32 %v2964_v63, 0.0  ;;  %v3715_v8 = vmax.f32 %v2899_v33, 0.0  ;;  %v416_v27 = vunpack.c.l.bf16 %v3030_v16  ;;  %v417_v61 = vunpack.c.h.bf16 %v3030_v16 }
  0xc6   :  { %v245_v23 = vpack.c.bf16 %v242_v38, %v241_v48  ;;  %v3039_v6 = vpack.c.bf16 %v3713_v28, %v3712_v1  ;;  %v180_v54 = vunpack.c.l.bf16 %v3032_v21  ;;  %v181_v57 = vunpack.c.h.bf16 %v3032_v21 }
  0xc7   :  { %v3045_v2 = vpack.c.bf16 %v3715_v8, %v3714_v24  ;;  %v3051_v60 = vpack.c.bf16 %v468_v42, %v467_v26  ;;  %v3053_v31 = vpack.c.bf16 %v232_v15, %v231_v39  ;;  %v420_v25 = vsub.f32 %v408_v20, %v416_v27 }
  0xc8   :  { %v532_v51 = vunpack.c.l.bf16 %v3039_v6  ;;  %v533_v50 = vunpack.c.h.bf16 %v3039_v6  ;;  %v421_v4 = vsub.f32 %v409_v0, %v417_v61  ;;  %v184_v17 = vsub.f32 %v172_v47, %v180_v54 }
  0xc9   :  { %v185_v45 = vsub.f32 %v173_v34, %v181_v57  ;;  %v475_v22 = vunpack.c.l.bf16 %v3051_v60  ;;  %v476_v44 = vunpack.c.h.bf16 %v3051_v60  ;;  %v239_v48 = vunpack.c.l.bf16 %v3053_v31 }
  0xca   :  { %v240_v53 = vunpack.c.h.bf16 %v3053_v31  ;;  %v423_v38 = vpack.c.bf16 %v421_v4, %v420_v25  ;;  %v536_v28 = vsub.f32 %v3712_v1, %v532_v51  ;;  %v3716_v24 = vmax.f32 %v2896_v32, 0.0 }
  0xcb   :  { %v187_v35 = vpack.c.bf16 %v185_v45, %v184_v17  ;;  %v479_v20 = vsub.f32 %v467_v26, %v475_v22  ;;  %v480_v0 = vsub.f32 %v468_v42, %v476_v44  ;;  %v243_v47 = vsub.f32 %v231_v39, %v239_v48  ;;  %v3074_v26 = vld [vmem:[%s3680_s0 + $0x17] ss:$0 sm:$0xff] }
  0xcc   :  { %v537_v8 = vsub.f32 %v3716_v24, %v533_v50  ;;  %v244_v34 = vsub.f32 %v232_v15, %v240_v53  ;;  %2000 = vmatprep.subr.bf16.mxu0 %v423_v38  ;;  %2335 = vmatprep.subr.bf16.mxu1 %v423_v38  ;;  %v296_v61 = vunpack.c.l.bf16 %v3045_v2  ;;  %v297_v54 = vunpack.c.h.bf16 %v3045_v2  ;;  %v3719_v44 = vld [vmem:[#allocation15_spill] sm:$0xff] }
  0xcd   :  { %v522_v57 = vadd.f32 %v2929_v55, %v2970_v5  ;;  %2001 = vmatpush3.bf16.msra.mxu0 %v187_v35  ;;  %2343 = vmatpush3.bf16.msra.mxu1 %v187_v35  ;;  %v482_v43 = vpack.c.bf16 %v480_v0, %v479_v20  ;;  %v523_v32 = vadd.f32 %v2933_v49, %v3010_v59  ;;  %v3717_v42 = vmax.f32 %v2964_v63, 0.0  ;;  %v3085_v49 = vld [vmem:[%s3680_s0 + $0x9] ss:$0 sm:$0xff] }
  0xce   :  { %v540_v27 = vpack.c.bf16 %v537_v8, %v536_v28  ;;  %v246_v51 = vpack.c.bf16 %v244_v34, %v243_v47  ;;  %2002 = vmatprep.subr.bf16.mxu0 %v481_v13  ;;  %2336 = vmatprep.subr.bf16.mxu1 %v481_v13  ;;  %v3718_v15 = vmax.f32 %v2899_v33, 0.0  ;;  %v286_v25 = vadd.f32 %v2966_v9, %v2970_v5  ;;  %v3096_v13 = vld [vmem:[%s3680_s0 + $0xa] ss:$0 sm:$0xff] }
  0xcf   :  { %v300_v39 = vsub.f32 %v3717_v42, %v296_v61  ;;  %v526_v50 = vmax.f32 %v522_v57, 0.0  ;;  %v527_v4 = vmax.f32 %v523_v32, 0.0  ;;  %v287_v17 = vadd.f32 %v2968_v11, %v3010_v59  ;;  %v3720_v11 = vld [vmem:[#allocation14_spill] sm:$0xff]  ;;  %v3723_v61 = vld [vmem:[#allocation13_spill] sm:$0xff] }
  0xd0   :  { %v301_v55 = vsub.f32 %v3718_v15, %v297_v54  ;;  %v562_v63 = vadd.f32 %v2976_v29, %v2939_v40  ;;  %v563_v33 = vadd.f32 %v2980_v30, %v2943_v62  ;;  %v2532_v9 = vmov 0   ;;  %v3721_v40 = vld [vmem:[#allocation11_spill] sm:$0xff]  ;;  %v3722_v29 = vld [vmem:[#allocation10_spill] sm:$0xff]  ;;  %v34_v32 = vld [vmem:[%s3682_s2 + $0x20] sm:$0xff] }
  0xd1   :  { %2371 = vset.pattern.permute.xlu1 %v2532_v9  ;;  %2370 = vset.pattern.permute.xlu0 %v2532_v9  ;;  %v290_v22 = vmax.f32 %v286_v25, 0.0  ;;  %v571_v48 = vmul.f32 %v3074_v26, %v3719_v44  ;;  %v572_v53 = vmul.f32 %v3074_v26, %v3720_v11  ;;  %v3104_v62 = vpack.c.bf16 %v527_v4, %v526_v50  ;;  %v3725_v9 = vld [vmem:[#allocation16_spill] sm:$0xff] }
  0xd2   :  { %v304_v45 = vpack.c.bf16 %v301_v55, %v300_v39  ;;  %1539 = vperm.xlu1 %2371, %v3721_v40   ;;  %1535 = vperm.xlu0 %2370, %v3722_v29   ;;  %v291_v30 = vmax.f32 %v287_v17, 0.0  ;;  %v313_v38 = vmul.f32 %v3085_v49, %v2646_v19  ;;  %v314_v35 = vmul.f32 %v3085_v49, %v2694_v37  ;;  %v3121_v19 = vld [vmem:[%s3680_s0 + $0xb] ss:$0 sm:$0xff]  ;;  %v3724_v17 = vld [vmem:[#allocation12_spill] sm:$0xff] }
  0xd3   :  { %2003 = vmatpush3.bf16.msra.mxu0 %v245_v23  ;;  %2344 = vmatpush3.bf16.msra.mxu1 %v245_v23  ;;  %v575_v1 = vadd.f32 %v571_v48, %v562_v63  ;;  %v576_v28 = vadd.f32 %v572_v53, %v563_v33  ;;  %v322_v24 = vmul.f32 %v3096_v13, %v2644_v18  ;;  %v534_v8 = vunpack.c.l.bf16 %v3104_v62  ;;  %v35_v48 = vld [vmem:[%s3682_s2 + $0x28] sm:$0xff]  ;;  %v3726_v53 = vld [vmem:[#allocation17_spill] sm:$0xff] }
  0xd4   :  { %2004 = vmatprep.subr.bf16.mxu0 %v482_v43  ;;  %2337 = vmatprep.subr.bf16.mxu1 %v482_v43  ;;  %v535_v23 = vunpack.c.h.bf16 %v3104_v62  ;;  %v3114_v20 = vpack.c.bf16 %v291_v30, %v290_v22  ;;  %v323_v0 = vmul.f32 %v3096_v13, %v2692_v36  ;;  %v335_v18 = vmul.f32 %v3121_v19, %v3719_v44 }
  0xd5   :  { %v579_v37 = vadd.f32 %v575_v1, %v2931_v56  ;;  %v580_v47 = vadd.f32 %v576_v28, %v2864_v14  ;;  %v326_v34 = vadd.f32 %v322_v24, %v313_v38  ;;  %v538_v54 = vsub.f32 %v526_v50, %v534_v8 }
  0xd6   :  { %1543 = vperm.xlu1 %2371, %v3723_v61   ;;  %v539_v57 = vsub.f32 %v527_v4, %v535_v23  ;;  %v298_v36 = vunpack.c.l.bf16 %v3114_v20  ;;  %v299_v43 = vunpack.c.h.bf16 %v3114_v20  ;;  %v327_v15 = vadd.f32 %v323_v0, %v314_v35  ;;  %1547 = vperm.xlu0 %2370, %v3724_v17   ;;  %v40_v17 = vld [vmem:[%s3682_s2 + $0x50] sm:$0xff] }
  0xd7   :  { %2005 = vmatpush3.bf16.msra.mxu0 %v246_v51  ;;  %2345 = vmatpush3.bf16.msra.mxu1 %v246_v51  ;;  %v583_v42 = vmax.f32 %v579_v37, 0.0  ;;  %v584_v39 = vmax.f32 %v580_v47, 0.0  ;;  %v336_v55 = vmul.f32 %v3121_v19, %v3720_v11  ;;  %v339_v4 = vadd.f32 %v335_v18, %v326_v34 }
  0xd8   :  { %2006 = vmatprep.subr.bf16.mxu0 %v540_v27  ;;  %2338 = vmatprep.subr.bf16.mxu1 %v540_v27  ;;  %v541_v25 = vpack.c.bf16 %v539_v57, %v538_v54  ;;  %v302_v51 = vsub.f32 %v290_v22, %v298_v36  ;;  %v303_v50 = vsub.f32 %v291_v30, %v299_v43 }
  0xd9   :  { %v3136_v63 = vpack.c.bf16 %v584_v39, %v583_v42  ;;  %v340_v33 = vadd.f32 %v336_v55, %v327_v15  ;;  %v551_v44 = vmul.f32 %v2923_v46, %v3725_v9  ;;  %v552_v27 = vmul.f32 %v2923_v46, %v2740_v58 }
  0xda   :  { %1552 = vperm.xlu1 %2371, %v34_v32   ;;  %v305_v22 = vpack.c.bf16 %v303_v50, %v302_v51  ;;  %v343_v11 = vadd.f32 %v339_v4, %v2931_v56  ;;  %v560_v40 = vmul.f32 %v2956_v52, %v3726_v53  ;;  %v561_v38 = vmul.f32 %v2956_v52, %v2866_v3  ;;  %v37_v52 = vld [vmem:[%s3682_s2 + $0x38] sm:$0xff] }
  0xdb   :  { %2007 = vmatpush3.bf16.msra.mxu0 %v304_v45  ;;  %2346 = vmatpush3.bf16.msra.mxu1 %v304_v45  ;;  %v591_v29 = vunpack.c.l.bf16 %v3136_v63  ;;  %v592_v30 = vunpack.c.h.bf16 %v3136_v63  ;;  %v344_v46 = vadd.f32 %v340_v33, %v2864_v14  ;;  %v573_v45 = vmul.f32 %v3074_v26, %v2822_v10  ;;  %v36_v14 = vld [vmem:[%s3682_s2 + $0x30] sm:$0xff]  ;;  %v41_v33 = vld [vmem:[%s3682_s2 + $0x58] sm:$0xff] }
  0xdc   :  { %2008 = vmatprep.subr.bf16.mxu0 %v541_v25  ;;  %2339 = vmatprep.subr.bf16.mxu1 %v541_v25  ;;  %v347_v35 = vmax.f32 %v343_v11, 0.0  ;;  %v564_v1 = vadd.f32 %v560_v40, %v551_v44  ;;  %v574_v56 = vmul.f32 %v3074_v26, %v2901_v41  ;;  %v565_v23 = vadd.f32 %v561_v38, %v552_v27  ;;  %v46_v38 = vld [vmem:[%s3682_s2 + $0x80] sm:$0xff] }
  0xdd   :  { %1557 = vperm.xlu0 %2370, %v35_v48   ;;  %v595_v28 = vsub.f32 %v583_v42, %v591_v29  ;;  %v596_v24 = vsub.f32 %v584_v39, %v592_v30  ;;  %v348_v8 = vmax.f32 %v344_v46, 0.0  ;;  %v315_v37 = vmul.f32 %v3085_v49, %v3725_v9 }
  0xde   :  { %v577_v0 = vadd.f32 %v573_v45, %v564_v1  ;;  %v316_v26 = vmul.f32 %v3085_v49, %v2740_v58  ;;  %v578_v18 = vadd.f32 %v574_v56, %v565_v23  ;;  %v324_v61 = vmul.f32 %v3096_v13, %v3726_v53  ;;  %1562 = vperm.xlu1 %2371, %v36_v14   ;;  %v38_v58 = vld [vmem:[%s3682_s2 + $0x40] sm:$0xff]  ;;  %v51_v23 = vld [vmem:[%s3682_s2 + $0xa8] sm:$0xff] }
  0xdf   :  { %2009 = vmatpush3.bf16.msra.mxu0 %v305_v22  ;;  %2347 = vmatpush3.bf16.msra.mxu1 %v305_v22  ;;  %v599_v47 = vpack.c.bf16 %v596_v24, %v595_v28  ;;  %v3167_v34 = vpack.c.bf16 %v348_v8, %v347_v35  ;;  %v325_v57 = vmul.f32 %v3096_v13, %v2866_v3  ;;  %v42_v53 = vld [vmem:[%s3682_s2 + $0x60] sm:$0xff] }
  0xe0   :  { %v581_v54 = vadd.f32 %v577_v0, %v2970_v5  ;;  %v337_v36 = vmul.f32 %v3121_v19, %v2822_v10  ;;  %v338_v43 = vmul.f32 %v3121_v19, %v2901_v41  ;;  %v582_v42 = vadd.f32 %v578_v18, %v3010_v59  ;;  %v39_v10 = vld [vmem:[%s3682_s2 + $0x48] sm:$0xff]  ;;  %v3215_v28 = vld [vmem:[#allocation4] ss:$16 sps:$4 sm:$0xff]   ;;  %v3227_v14 = vld [vmem:[#allocation4 + $0x24] ss:$16 sps:$4 sm:$0xff]  }
  0xe1   :  { %1567 = vperm.xlu0 %2370, %v37_v52   ;;  %2010 = vmatprep.subr.bf16.mxu0 %v599_v47  ;;  %v355_v49 = vunpack.c.l.bf16 %v3167_v34  ;;  %v356_v32 = vunpack.c.h.bf16 %v3167_v34  ;;  %v328_v3 = vadd.f32 %v324_v61, %v315_v37  ;;  %v329_v41 = vadd.f32 %v325_v57, %v316_v26  ;;  %v3217_v24 = vld [vmem:[#allocation4 + $0x100] ss:$16 sps:$4 sm:$0xff]   ;;  %v3229_v52 = vld [vmem:[#allocation4 + $0x124] ss:$16 sps:$4 sm:$0xff]   ;;  %v3727_v0 = vld [vmem:[#allocation18_spill] sm:$0xff] }
  0xe2   :  { %2340 = vmatprep.subr.bf16.mxu1 %v599_v47  ;;  %v585_v13 = vmax.f32 %v581_v54, 0.0  ;;  %v586_v15 = vmax.f32 %v582_v42, 0.0  ;;  %1572 = vperm.xlu1 %2371, %v38_v58   ;;  %v54_v37 = vld [vmem:[%s3682_s2 + $0xc0] sm:$0xff]  ;;  %v3728_v18 = vld [vmem:[#allocation19_spill] sm:$0xff]  ;;  %v59_v54 = vld [vmem:[%s3682_s2 + $0xe8] sm:$0xff] }
  0xe3   :  { %v359_v19 = vsub.f32 %v347_v35, %v355_v49  ;;  %v360_v39 = vsub.f32 %v348_v8, %v356_v32  ;;  %v341_v55 = vadd.f32 %v337_v36, %v328_v3  ;;  %v342_v25 = vadd.f32 %v338_v43, %v329_v41  ;;  %v47_v35 = vld [vmem:[%s3682_s2 + $0x88] sm:$0xff]  ;;  %v50_v8 = vld [vmem:[%s3682_s2 + $0xa0] sm:$0xff]  ;;  %v60_v3 = vld [vmem:[%s3682_s2 + $0xf0] sm:$0xff] }
  0xe4   :  { %v3187_v50 = vpack.c.bf16 %v586_v15, %v585_v13  ;;  %v3245_v26 = vld [vmem:[#allocation4 + $0x20] ss:$16 sps:$4 sm:$0xff]   ;;  %v3253_v61 = vld [vmem:[#allocation4 + $0x44] ss:$16 sps:$4 sm:$0xff]   ;;  %v53_v41 = vld [vmem:[%s3682_s2 + $0xb8] sm:$0xff] }
  0xe5   :  { %1577 = vperm.xlu0 %2370, %v39_v10   ;;  %v363_v51 = vpack.c.bf16 %v360_v39, %v359_v19  ;;  %v345_v4 = vadd.f32 %v341_v55, %v2970_v5  ;;  %v346_v9 = vadd.f32 %v342_v25, %v3010_v59  ;;  %v43_v59 = vld [vmem:[%s3682_s2 + $0x68] sm:$0xff]  ;;  %v3247_v47 = vld [vmem:[#allocation4 + $0x120] ss:$16 sps:$4 sm:$0xff]   ;;  %v3331_v42 = vld [vmem:[#allocation4 + $0x1a4] ss:$16 sps:$4 sm:$0xff]  }
  0xe6   :  { %v593_v44 = vunpack.c.l.bf16 %v3187_v50  ;;  %v594_v27 = vunpack.c.h.bf16 %v3187_v50  ;;  %1582 = vperm.xlu1 %2371, %v40_v17   ;;  %v3271_v57 = vld [vmem:[#allocation4 + $0x40] ss:$16 sps:$4 sm:$0xff]   ;;  %v45_v10 = vld [vmem:[%s3682_s2 + $0x78] sm:$0xff]  ;;  %v3355_v55 = vld [vmem:[#allocation4 + $0x1c4] ss:$16 sps:$4 sm:$0xff]  }
  0xe7   :  { %2011 = vmatpush3.bf16.msra.mxu0 %v363_v51  ;;  %2348 = vmatpush3.bf16.msra.mxu1 %v363_v51  ;;  %v349_v48 = vmax.f32 %v345_v4, 0.0  ;;  %v350_v22 = vmax.f32 %v346_v9, 0.0  ;;  %v3273_v36 = vld [vmem:[#allocation4 + $0x140] ss:$16 sps:$4 sm:$0xff]   ;;  %v57_v25 = vld [vmem:[%s3682_s2 + $0xd8] sm:$0xff]  ;;  %v2533_v9 = vmov 5  }
  0xe8   :  { %v597_v5 = vsub.f32 %v585_v13, %v593_v44  ;;  %v598_v11 = vsub.f32 %v586_v15, %v594_v27  ;;  %v3297_v43 = vld [vmem:[#allocation4 + $0x60] ss:$16 sps:$4 sm:$0xff]   ;;  %v49_v13 = vld [vmem:[%s3682_s2 + $0x98] sm:$0xff]  ;;  %v3353_v15 = vld [vmem:[#allocation4 + $0xc4] ss:$16 sps:$4 sm:$0xff]  }
  0xe9   :  { %1587 = vperm.xlu0 %2370, %v41_v33   ;;  %v3205_v40 = vpack.c.bf16 %v350_v22, %v349_v48  ;;  %v3299_v58 = vld [vmem:[#allocation4 + $0x160] ss:$16 sps:$4 sm:$0xff]   ;;  %v61_v51 = vld [vmem:[%s3682_s2 + $0xf8] sm:$0xff]  ;;  %v3371_v17 = vld [vmem:[#allocation4 + $0xe4] ss:$16 sps:$4 sm:$0xff]  }
  0xea   :  { %v600_v29 = vpack.c.bf16 %v598_v11, %v597_v5  ;;  %1592 = vperm.xlu1 %2371, %v42_v53   ;;  %v3323_v49 = vld [vmem:[#allocation4 + $0x80] ss:$16 sps:$4 sm:$0xff]   ;;  %v3373_v33 = vld [vmem:[#allocation4 + $0x1e4] ss:$16 sps:$4 sm:$0xff]   ;;  %v2472_v27 = vld [vmem:[%s3682_s2 + $0x8] sm:$0xff] }
  0xeb   :  { %v357_v30 = vunpack.c.l.bf16 %v3205_v40  ;;  %v358_v46 = vunpack.c.h.bf16 %v3205_v40  ;;  %v3325_v32 = vld [vmem:[#allocation4 + $0x180] ss:$16 sps:$4 sm:$0xff]   ;;  %v2425_v53 = vld [vmem:[#allocation4 + $0xc] ss:$16 sps:$4 sm:$0xff]  }
  0xec   :  { %2012 = vmatprep.subr.bf16.mxu0 %v600_v29  ;;  %2341 = vmatprep.subr.bf16.mxu1 %v600_v29  ;;  %v3349_v19 = vld [vmem:[#allocation4 + $0xa0] ss:$16 sps:$4 sm:$0xff]   ;;  %v2475_v29 = vld [vmem:[#allocation4 + $0x4] ss:$16 sps:$4 sm:$0xff]  }
  0xed   :  { %1597 = vperm.xlu0 %2370, %v43_v59   ;;  %v361_v1 = vsub.f32 %v349_v48, %v357_v30  ;;  %v362_v45 = vsub.f32 %v350_v22, %v358_v46  ;;  %v3351_v39 = vld [vmem:[#allocation4 + $0x1a0] ss:$16 sps:$4 sm:$0xff]   ;;  %v2534_v22 = vmov 6   ;;  %v2474_v59 = vld [vmem:[%s3682_s2 + $0x18] sm:$0xff] }
  0xee   :  { %1612 = vperm.xlu1 %2371, %v46_v38   ;;  %v3369_v4 = vld [vmem:[#allocation4 + $0x1c0] ss:$16 sps:$4 sm:$0xff]   ;;  %v2423_v30 = vld [vmem:[#allocation4 + $0x8] ss:$16 sps:$4 sm:$0xff]   ;;  %v2426_v46 = vld [vmem:[#allocation4 + $0x2c] ss:$16 sps:$4 sm:$0xff]  }
  0xef   :  { %v364_v56 = vpack.c.bf16 %v362_v45, %v361_v1  ;;  %v2471_v44 = vld [vmem:[%s3682_s2] sm:$0xff]  ;;  %v2473_v48 = vld [vmem:[%s3682_s2 + $0x10] sm:$0xff]  ;;  %v2428_v38 = vld [vmem:[#allocation4 + $0x28] ss:$16 sps:$4 sm:$0xff]  }
  0xf0   :  { %v2421_v5 = vld [vmem:[#allocation4 + $0xe0] ss:$16 sps:$4 sm:$0xff]   ;;  %v2431_v1 = vld [vmem:[#allocation4 + $0x48] ss:$16 sps:$4 sm:$0xff]   ;;  %v2432_v45 = vld [vmem:[#allocation4 + $0x6c] ss:$16 sps:$4 sm:$0xff]  }
  0xf1   :  { %1617 = vperm.xlu0 %2370, %v47_v35   ;;  %2013 = vmatpush3.bf16.msra.mxu0 %v364_v56  ;;  %v3388_v11 = vld [vmem:[#allocation4 + $0x1e0] ss:$16 sps:$4 sm:$0xff]   ;;  %v2429_v35 = vld [vmem:[#allocation4 + $0x4c] ss:$16 sps:$4 sm:$0xff]  }
  0xf2   :  { %2349 = vmatpush3.bf16.msra.mxu1 %v364_v56  ;;  %2222 = vmatprep.subr.bf16.mxu0 %v2984_v12  ;;  %v2434_v56 = vld [vmem:[#allocation4 + $0x68] ss:$16 sps:$4 sm:$0xff]  }
  0xf3   :  { %2110 = vmatprep.subr.bf16.mxu1 %v2984_v12  ;;  %1632 = vperm.xlu1 %2371, %v50_v8   ;;  %v55_v12 = vld [vmem:[%s3682_s2 + $0xc8] sm:$0xff] }
  0xf4   :  { %892 = vmatmul.mubr.bf16.vlgmr.msra.gmra.mrb[0].mxu0 %v3215_v28  ;;  %v2437_v8 = vld [vmem:[#allocation4 + $0x88] ss:$16 sps:$4 sm:$0xff]  }
  0xf5   :  { %1637 = vperm.xlu0 %2370, %v51_v23   ;;  %956 = vmatmul.mubr.bf16.vlgmr.msra.gmra.mrb[0].mxu1 %v3217_v24  ;;  %v2438_v23 = vld [vmem:[#allocation4 + $0xac] ss:$16 sps:$4 sm:$0xff]  }
  0xf6   :  { %2111 = vmatpush3.bf16.msra.mxu1 %v3727_v0  ;;  %2223 = vmatpush3.bf16.msra.mxu0 %v3727_v0  ;;  %v2441_v0 = vld [vmem:[#allocation4 + $0xcc] ss:$16 sps:$4 sm:$0xff]  }
  0xf7   :  { %2112 = vmatprep.subr.bf16.mxu1 %v3030_v16  ;;  %2224 = vmatprep.subr.bf16.mxu0 %v3030_v16  ;;  %v3255_v16 = vld [vmem:[#allocation4 + $0x144] ss:$16 sps:$4 sm:$0xff]  }
  0xf8   :  { %899 = vmatprep.mubr.bf16.mxu0 %v3227_v14  ;;  %963 = vmatprep.mubr.bf16.mxu1 %v3229_v52 }
  0xf9   :  { %1652 = vperm.xlu1 %2371, %v54_v37   ;;  %1657 = vperm.xlu0 %2370, %v55_v12   ;;  %v2443_v37 = vld [vmem:[#allocation4 + $0xc8] ss:$16 sps:$4 sm:$0xff]   ;;  %v2444_v12 = vld [vmem:[#allocation4 + $0xec] ss:$16 sps:$4 sm:$0xff]  }
  0xfa   :  { %2113 = vmatpush3.bf16.msra.mxu1 %v3032_v21  ;;  %2225 = vmatpush3.bf16.msra.mxu0 %v3032_v21  ;;  %v58_v21 = vld [vmem:[%s3682_s2 + $0xe0] sm:$0xff] }
  0xfb   :  { %2114 = vmatprep.subr.bf16.mxu1 %v3728_v18  ;;  %2226 = vmatprep.subr.bf16.mxu0 %v3728_v18  ;;  %v2447_v18 = vld [vmem:[#allocation4 + $0x10c] ss:$16 sps:$4 sm:$0xff]  }
  0xfc   :  { %900 = vmatmul.mubr.bf16.gmra.mrb[4].mxu0 %v3245_v26 }
  0xfd   :  { %964 = vmatmul.mubr.bf16.gmra.mrb[4].mxu1 %v3247_v47  ;;  %907 = vmatprep.mubr.bf16.mxu0 %v3253_v61 }
  0xfe   :  { %2115 = vmatpush3.bf16.msra.mxu1 %v2998_v7  ;;  %2227 = vmatpush3.bf16.msra.mxu0 %v2998_v7  ;;  %v3279_v7 = vld [vmem:[#allocation4 + $0x64] ss:$16 sps:$4 sm:$0xff]  }
  0xff   :  { %2116 = vmatprep.subr.bf16.mxu1 %v3051_v60  ;;  %2228 = vmatprep.subr.bf16.mxu0 %v3051_v60  ;;  %v3281_v60 = vld [vmem:[#allocation4 + $0x164] ss:$16 sps:$4 sm:$0xff]  }
 0x100   :  { %971 = vmatprep.mubr.bf16.mxu1 %v3255_v16  ;;  %1672 = vperm.xlu1 %2371, %v58_v21   ;;  %v2449_v21 = vld [vmem:[#allocation4 + $0x108] ss:$16 sps:$4 sm:$0xff]  }
 0x101   :  { %1677 = vperm.xlu0 %2370, %v59_v54   ;;  %v2450_v54 = vld [vmem:[#allocation4 + $0x12c] ss:$16 sps:$4 sm:$0xff]  }
 0x102   :  { %2117 = vmatpush3.bf16.msra.mxu1 %v3053_v31  ;;  %2229 = vmatpush3.bf16.msra.mxu0 %v3053_v31  ;;  %v44_v31 = vld [vmem:[%s3682_s2 + $0x70] sm:$0xff] }
 0x103   :  { %2118 = vmatprep.subr.bf16.mxu1 %v3039_v6  ;;  %2230 = vmatprep.subr.bf16.mxu0 %v3039_v6  ;;  %v48_v6 = vld [vmem:[%s3682_s2 + $0x90] sm:$0xff] }
 0x104   :  { %908 = vmatmul.mubr.bf16.gmra.mrb[8].mxu0 %v3271_v57  ;;  %1602 = vperm.xlu1 %2371, %v44_v31   ;;  %v2455_v31 = vld [vmem:[#allocation4 + $0x148] ss:$16 sps:$4 sm:$0xff]  }
 0x105   :  { %972 = vmatmul.mubr.bf16.gmra.mrb[8].mxu1 %v3273_v36  ;;  %915 = vmatprep.mubr.bf16.mxu0 %v3279_v7 }
 0x106   :  { %2119 = vmatpush3.bf16.msra.mxu1 %v3045_v2  ;;  %2231 = vmatpush3.bf16.msra.mxu0 %v3045_v2  ;;  %v3305_v2 = vld [vmem:[#allocation4 + $0x84] ss:$16 sps:$4 sm:$0xff]  }
 0x107   :  { %2120 = vmatprep.subr.bf16.mxu1 %v3104_v62  ;;  %2232 = vmatprep.subr.bf16.mxu0 %v3104_v62  ;;  %v3307_v62 = vld [vmem:[#allocation4 + $0x184] ss:$16 sps:$4 sm:$0xff]  }
 0x108   :  { %979 = vmatprep.mubr.bf16.mxu1 %v3281_v60  ;;  %1622 = vperm.xlu0 %2370, %v48_v6   ;;  %v2456_v6 = vld [vmem:[#allocation4 + $0x16c] ss:$16 sps:$4 sm:$0xff]  }
 0x10a   :  { %2121 = vmatpush3.bf16.msra.mxu1 %v3114_v20  ;;  %2233 = vmatpush3.bf16.msra.mxu0 %v3114_v20  ;;  %v52_v20 = vld [vmem:[%s3682_s2 + $0xb0] sm:$0xff] }
 0x10b   :  { %2122 = vmatprep.subr.bf16.mxu1 %v3136_v63  ;;  %2234 = vmatprep.subr.bf16.mxu0 %v3136_v63  ;;  %v56_v63 = vld [vmem:[%s3682_s2 + $0xd0] sm:$0xff] }
 0x10c   :  { %916 = vmatmul.mubr.bf16.gmra.mrb[12].mxu0 %v3297_v43  ;;  %1642 = vperm.xlu1 %2371, %v52_v20   ;;  %v2468_v20 = vld [vmem:[#allocation4 + $0x1ec] ss:$16 sps:$4 sm:$0xff]  }
 0x10d   :  { %980 = vmatmul.mubr.bf16.gmra.mrb[12].mxu1 %v3299_v58  ;;  %923 = vmatprep.mubr.bf16.mxu0 %v3305_v2 }
 0x10e   :  { %2123 = vmatpush3.bf16.msra.mxu1 %v3167_v34  ;;  %2235 = vmatpush3.bf16.msra.mxu0 %v3167_v34  ;;  %v3329_v34 = vld [vmem:[#allocation4 + $0xa4] ss:$16 sps:$4 sm:$0xff]  }
 0x10f   :  { %2124 = vmatprep.subr.bf16.mxu1 %v3187_v50  ;;  %2236 = vmatprep.subr.bf16.mxu0 %v3187_v50  ;;  %v3367_v50 = vld [vmem:[#allocation4 + $0xc0] ss:$16 sps:$4 sm:$0xff]  }
 0x110   :  { %987 = vmatprep.mubr.bf16.mxu1 %v3307_v62  ;;  %1662 = vperm.xlu0 %2370, %v56_v63  }
 0x111   :  { %1682 = vperm.xlu1 %2371, %v60_v3  }
 0x112   :  { %2125 = vmatpush3.bf16.msra.mxu1 %v3205_v40  ;;  %2237 = vmatpush3.bf16.msra.mxu0 %v3205_v40  ;;  %v62_v40 = vld [vmem:[%s3682_s2] sm:$0x1]  ;;  %s2535_s2 = smov [#allocation7]  }
 0x113   :  { %s1901_s5 = sshll.u32 %s2535_s2, 4  ;;  %s1902_s5 = int_to_ptr.vmem [resolvable:$true] %s1901_s5 }
 0x114   :  { %924 = vmatmul.mubr.bf16.gmra.mrb[16].mxu0 %v3323_v49  ;;  %1607 = vperm.xlu0 %2370, %v45_v10   ;;  %s2499_s6 = scalar_lea.vmem %s1902_s5, 128  ;;  %p2504_p9 = scmp.lt.s32.totalorder %s1902_s5, %s1902_s5 }
 0x115   :  { %988 = vmatmul.mubr.bf16.gmra.mrb[16].mxu1 %v3325_v32  ;;  %931 = vmatprep.mubr.bf16.mxu0 %v3329_v34  ;;  %p2500_p8 = scmp.ne.s32.totalorder %s1902_s5, %s2499_s6  ;;  %p2505_p10 = scmp.lt.s32.totalorder %s2499_s6, %s2499_s6 }
 0x116   :  { %995 = vmatprep.mubr.bf16.mxu1 %v3331_v42  ;;  %1627 = vperm.xlu1 %2371, %v49_v13  }
 0x117   :  { %p2506_p11 = por %p2505_p10, %p2504_p9 }
 0x118   :  { %1647 = vperm.xlu0 %2370, %v53_v41  }
 0x119   :  { %p2507_p12 = pnand %p2506_p11, %p2500_p8 }
 0x11a   :  { %1667 = vperm.xlu1 %2371, %v57_v25  }
 0x11c   :  { %932 = vmatmul.mubr.bf16.gmra.mrb[20].mxu0 %v3349_v19  ;;  %1687 = vperm.xlu0 %2370, %v61_v51  }
 0x11d   :  { %996 = vmatmul.mubr.bf16.gmra.mrb[20].mxu1 %v3351_v39  ;;  %939 = vmatprep.mubr.bf16.mxu0 %v3353_v15 }
 0x11e   :  { %1003 = vmatprep.mubr.bf16.mxu1 %v3355_v55  ;;  %2372 = vset.pattern.permute.xlu1 %v2533_v9 }
 0x11f   :  { %1755 = vperm.xlu1 %2372, %v2471_v44  }
 0x120   :  { %2373 = vset.pattern.permute.xlu0 %v2533_v9 }
 0x121   :  { %1759 = vperm.xlu0 %2373, %v2472_v27  }
 0x123   :  { %1763 = vperm.xlu1 %2372, %v2473_v48  }
 0x124   :  { %940 = vmatmul.mubr.bf16.gmra.mrb[24].mxu0 %v3367_v50 }
 0x125   :  { %1004 = vmatmul.mubr.bf16.gmra.mrb[24].mxu1 %v3369_v4  ;;  %947 = vmatprep.mubr.bf16.mxu0 %v3371_v17 }
 0x126   :  { %1011 = vmatprep.mubr.bf16.mxu1 %v3373_v33  ;;  %2374 = vset.pattern.permute.xlu0 %v2534_v22 }
 0x127   :  { %1767 = vperm.xlu1 %2372, %v2474_v59   ;;  %1785 = vperm.xlu0 %2374, %v62_v40  }
 0x12c   :  { %948 = vmatmul.mubr.bf16.gmra.mrb[28].mxu0 %v2421_v5 }
 0x12d   :  { %1012 = vmatmul.mubr.bf16.gmra.mrb[28].mxu1 %v3388_v11  ;;  %1373 = vmatprep.mubr.bf16.mxu0 %v2425_v53 }
 0x12e   :  { %1052 = vmatprep.mubr.bf16.mxu1 %v2475_v29 }
 0x134   :  { %1374 = vmatmul.mubr.bf16.vlgmr.msra.gmra.mrb[32].mxu0 %v2423_v30 }
 0x135   :  { %1053 = vmatmul.mubr.bf16.vlgmr.msra.gmra.mrb[32].mxu1 %v3215_v28  ;;  %1381 = vmatprep.mubr.bf16.mxu0 %v2426_v46  ;;  %v2435_v28 = vld [vmem:[#allocation4 + $0x8c] ss:$16 sps:$4 sm:$0xff]  }
 0x136   :  { %1060 = vmatprep.mubr.bf16.mxu1 %v3227_v14  ;;  %v2440_v14 = vld [vmem:[#allocation4 + $0xa8] ss:$16 sps:$4 sm:$0xff]  }
 0x13c   :  { %1382 = vmatmul.mubr.bf16.gmra.mrb[36].mxu0 %v2428_v38 }
 0x13d   :  { %1061 = vmatmul.mubr.bf16.gmra.mrb[36].mxu1 %v3245_v26  ;;  %1389 = vmatprep.mubr.bf16.mxu0 %v2429_v35  ;;  %v2446_v26 = vld [vmem:[#allocation4 + $0xe8] ss:$16 sps:$4 sm:$0xff]  }
 0x13e   :  { %1068 = vmatprep.mubr.bf16.mxu1 %v3253_v61  ;;  %v2476_v61 = vld [vmem:[#allocation4 + $0x104] ss:$16 sps:$4 sm:$0xff]  }
 0x144   :  { %1390 = vmatmul.mubr.bf16.gmra.mrb[40].mxu0 %v2431_v1 }
 0x145   :  { %1069 = vmatmul.mubr.bf16.gmra.mrb[40].mxu1 %v3271_v57  ;;  %1397 = vmatprep.mubr.bf16.mxu0 %v2432_v45  ;;  %v2452_v57 = vld [vmem:[#allocation4 + $0x128] ss:$16 sps:$4 sm:$0xff]  }
 0x146   :  { %1076 = vmatprep.mubr.bf16.mxu1 %v3279_v7  ;;  %v2453_v7 = vld [vmem:[#allocation4 + $0x14c] ss:$16 sps:$4 sm:$0xff]  }
 0x14c   :  { %1398 = vmatmul.mubr.bf16.gmra.mrb[44].mxu0 %v2434_v56 }
 0x14d   :  { %1077 = vmatmul.mubr.bf16.gmra.mrb[44].mxu1 %v3297_v43  ;;  %1405 = vmatprep.mubr.bf16.mxu0 %v2435_v28  ;;  %v2459_v43 = vld [vmem:[#allocation4 + $0x18c] ss:$16 sps:$4 sm:$0xff]  }
 0x14e   :  { %1084 = vmatprep.mubr.bf16.mxu1 %v3305_v2 }
 0x154   :  { %1406 = vmatmul.mubr.bf16.gmra.mrb[48].mxu0 %v2437_v8 }
 0x155   :  { %1085 = vmatmul.mubr.bf16.gmra.mrb[48].mxu1 %v3323_v49  ;;  %1413 = vmatprep.mubr.bf16.mxu0 %v2438_v23 }
 0x156   :  { %1092 = vmatprep.mubr.bf16.mxu1 %v3329_v34 }
 0x15c   :  { %1414 = vmatmul.mubr.bf16.gmra.mrb[52].mxu0 %v2440_v14 }
 0x15d   :  { %1093 = vmatmul.mubr.bf16.gmra.mrb[52].mxu1 %v3349_v19  ;;  %1421 = vmatprep.mubr.bf16.mxu0 %v2441_v0 }
 0x15e   :  { %1100 = vmatprep.mubr.bf16.mxu1 %v3353_v15 }
 0x164   :  { %1422 = vmatmul.mubr.bf16.gmra.mrb[56].mxu0 %v2443_v37 }
 0x165   :  { %1101 = vmatmul.mubr.bf16.gmra.mrb[56].mxu1 %v3367_v50  ;;  %1429 = vmatprep.mubr.bf16.mxu0 %v2444_v12 }
 0x166   :  { %1108 = vmatprep.mubr.bf16.mxu1 %v3371_v17 }
 0x16c   :  { %1430 = vmatmul.mubr.bf16.gmra.mrb[60].mxu0 %v2446_v26 }
 0x16d   :  { %1109 = vmatmul.mubr.bf16.gmra.mrb[60].mxu1 %v2421_v5  ;;  %1437 = vmatprep.mubr.bf16.mxu0 %v2447_v18 }
 0x16e   :  { %1116 = vmatprep.mubr.bf16.mxu1 %v2476_v61 }
 0x174   :  { %1438 = vmatmul.mubr.bf16.gmra.mrb[64].mxu0 %v2449_v21 }
 0x175   :  { %1117 = vmatmul.mubr.bf16.gmra.mrb[64].mxu1 %v3217_v24  ;;  %1445 = vmatprep.mubr.bf16.mxu0 %v2450_v54  ;;  %v2458_v24 = vld [vmem:[#allocation4 + $0x168] ss:$16 sps:$4 sm:$0xff]  }
 0x176   :  { %1124 = vmatprep.mubr.bf16.mxu1 %v3229_v52  ;;  %v2461_v52 = vld [vmem:[#allocation4 + $0x188] ss:$16 sps:$4 sm:$0xff]  }
 0x17c   :  { %1446 = vmatmul.mubr.bf16.gmra.mrb[68].mxu0 %v2452_v57 }
 0x17d   :  { %1125 = vmatmul.mubr.bf16.gmra.mrb[68].mxu1 %v3247_v47  ;;  %1453 = vmatprep.mubr.bf16.mxu0 %v2453_v7  ;;  %v2462_v47 = vld [vmem:[#allocation4 + $0x1ac] ss:$16 sps:$4 sm:$0xff]  }
 0x17e   :  { %1132 = vmatprep.mubr.bf16.mxu1 %v3255_v16  ;;  %v3421_v16 = vpop.permute.xlu1 %1539 }
 0x182   :  { %v3426_v2 = vpop.permute.xlu1 %1543 }
 0x184   :  { %1454 = vmatmul.mubr.bf16.gmra.mrb[72].mxu0 %v2455_v31 }
 0x185   :  { %1133 = vmatmul.mubr.bf16.gmra.mrb[72].mxu1 %v3273_v36  ;;  %1461 = vmatprep.mubr.bf16.mxu0 %v2456_v6  ;;  %v2464_v36 = vld [vmem:[#allocation4 + $0x1a8] ss:$16 sps:$4 sm:$0xff]  }
 0x186   :  { %1140 = vmatprep.mubr.bf16.mxu1 %v3281_v60  ;;  %v2465_v60 = vld [vmem:[#allocation4 + $0x1cc] ss:$16 sps:$4 sm:$0xff]   ;;  %v3431_v49 = vpop.permute.xlu1 %1552 }
 0x18c   :  { %1462 = vmatmul.mubr.bf16.gmra.mrb[76].mxu0 %v2458_v24 }
 0x18d   :  { %1141 = vmatmul.mubr.bf16.gmra.mrb[76].mxu1 %v3299_v58  ;;  %1469 = vmatprep.mubr.bf16.mxu0 %v2459_v43  ;;  %v3424_v58 = vpop.permute.xlu0 %1535 }
 0x18e   :  { %1148 = vmatprep.mubr.bf16.mxu1 %v3307_v62  ;;  %v2467_v62 = vld [vmem:[#allocation4 + $0x1c8] ss:$16 sps:$4 sm:$0xff]  }
 0x191   :  { %v3429_v63 = vpop.permute.xlu0 %1547 }
 0x194   :  { %1470 = vmatmul.mubr.bf16.gmra.mrb[80].mxu0 %v2461_v52 }
 0x195   :  { %1149 = vmatmul.mubr.bf16.gmra.mrb[80].mxu1 %v3325_v32  ;;  %1477 = vmatprep.mubr.bf16.mxu0 %v2462_v47  ;;  %v2470_v32 = vld [vmem:[#allocation4 + $0x1e8] ss:$16 sps:$4 sm:$0xff]   ;;  %v3435_v34 = vpop.permute.xlu0 %1557 }
 0x196   :  { %1156 = vmatprep.mubr.bf16.mxu1 %v3331_v42  ;;  %v3437_v42 = vpop.permute.xlu1 %1562 }
 0x199   :  { %v3440_v3 = vpop.permute.xlu0 %1567 }
 0x19a   :  { %v3442_v10 = vpop.permute.xlu1 %1572 }
 0x19c   :  { %1478 = vmatmul.mubr.bf16.gmra.mrb[84].mxu0 %v2464_v36 }
 0x19d   :  { %1157 = vmatmul.mubr.bf16.gmra.mrb[84].mxu1 %v3351_v39  ;;  %1485 = vmatprep.mubr.bf16.mxu0 %v2465_v60  ;;  %v3444_v13 = vpop.permute.xlu0 %1577 }
 0x19e   :  { %1164 = vmatprep.mubr.bf16.mxu1 %v3355_v55  ;;  %v3446_v41 = vpop.permute.xlu1 %1582 }
 0x1a1   :  { %v3448_v19 = vpop.permute.xlu0 %1587 }
 0x1a2   :  { %v3450_v39 = vpop.permute.xlu1 %1592 }
 0x1a4   :  { %1486 = vmatmul.mubr.bf16.gmra.mrb[88].mxu0 %v2467_v62 }
 0x1a5   :  { %1165 = vmatmul.mubr.bf16.gmra.mrb[88].mxu1 %v3369_v4  ;;  %1493 = vmatprep.mubr.bf16.mxu0 %v2468_v20  ;;  %v3452_v15 = vpop.permute.xlu0 %1597 }
 0x1a6   :  { %1172 = vmatprep.mubr.bf16.mxu1 %v3373_v33  ;;  %v3454_v55 = vpop.permute.xlu1 %1612 }
 0x1a9   :  { %v3456_v25 = vpop.permute.xlu0 %1617 }
 0x1aa   :  { %v3458_v51 = vpop.permute.xlu1 %1632 }
 0x1ab   :  { %3729 = vst [vmem:[#allocation15_spill] sm:$0xff] %v3458_v51 }
 0x1ac   :  { %1494 = vmatmul.mubr.bf16.gmra.mrb[92].mxu0 %v2470_v32 }
 0x1ad   :  { %1173 = vmatmul.mubr.bf16.gmra.mrb[92].mxu1 %v3388_v11  ;;  %v3468_v59 = vpop.permute.xlu0 %1637 }
 0x1ae   :  { %3730 = vst [vmem:[#allocation14_spill] sm:$0xff] %v3468_v59  ;;  %v3470_v40 = vpop.permute.xlu1 %1652 }
 0x1af   :  { %3731 = vst [vmem:[#allocation11_spill] sm:$0xff] %v3470_v40 }
 0x1b1   :  { %v3480_v0 = vpop.permute.xlu0 %1657 }
 0x1b2   :  { %3732 = vst [vmem:[#allocation10_spill] sm:$0xff] %v3480_v0  ;;  %v3482_v37 = vpop.permute.xlu1 %1672 }
 0x1b3   :  { %3733 = vst [vmem:[#allocation13_spill] sm:$0xff] %v3482_v37 }
 0x1b5   :  { %v3492_v52 = vpop.permute.xlu0 %1677 }
 0x1b6   :  { %3734 = vst [vmem:[#allocation12_spill] sm:$0xff] %v3492_v52  ;;  %v3494_v47 = vpop.permute.xlu1 %1602 }
 0x1c7   :  { %v2014_v50 = vpop.f32.mrb[0].mxu0 }
 0x1c8   :  { %v2062_v4 = vpop.f32.mrb[0].mxu1  ;;  %v2015_v17 = vpop.f32.mrb[1].mxu0 }
 0x1c9   :  { %v2063_v33 = vpop.f32.mrb[1].mxu1  ;;  %v3460_v9 = vadd.f32 %v2015_v17, %v2014_v50  ;;  %v2017_v27 = vpop.f32.mrb[2].mxu0 }
 0x1ca   :  { %v3462_v44 = vadd.f32 %v2063_v33, %v2062_v4  ;;  %v2065_v48 = vpop.f32.mrb[2].mxu1  ;;  %v2018_v22 = vpop.f32.mrb[3].mxu0 }
 0x1cb   :  { %v2066_v5 = vpop.f32.mrb[3].mxu1  ;;  %v3464_v11 = vadd.f32 %v2018_v22, %v2017_v27 }
 0x1cc   :  { %v3466_v53 = vadd.f32 %v2066_v5, %v2065_v48  ;;  %v3504_v5 = vpop.permute.xlu0 %1622 }
 0x1cf   :  { %v2020_v29 = vpop.f32.mrb[4].mxu0 }
 0x1d0   :  { %v2068_v30 = vpop.f32.mrb[4].mxu1  ;;  %v2021_v46 = vpop.f32.mrb[5].mxu0 }
 0x1d1   :  { %v2069_v38 = vpop.f32.mrb[5].mxu1  ;;  %v3472_v35 = vadd.f32 %v2021_v46, %v2020_v29  ;;  %v2023_v45 = vpop.f32.mrb[6].mxu0 }
 0x1d2   :  { %v3474_v1 = vadd.f32 %v2069_v38, %v2068_v30  ;;  %v2071_v56 = vpop.f32.mrb[6].mxu1  ;;  %v2024_v28 = vpop.f32.mrb[7].mxu0 }
 0x1d3   :  { %v2072_v8 = vpop.f32.mrb[7].mxu1  ;;  %v3476_v23 = vadd.f32 %v2024_v28, %v2023_v45  ;;  %v3506_v29 = vpop.permute.xlu1 %1642 }
 0x1d4   :  { %v3478_v14 = vadd.f32 %v2072_v8, %v2071_v56  ;;  %3737 = vst [vmem:[#allocation18_spill] sm:$0xff] %v3506_v29 }
 0x1d7   :  { %v2026_v12 = vpop.f32.mrb[8].mxu0 }
 0x1d8   :  { %v2074_v26 = vpop.f32.mrb[8].mxu1  ;;  %v2027_v18 = vpop.f32.mrb[9].mxu0 }
 0x1d9   :  { %v2075_v61 = vpop.f32.mrb[9].mxu1  ;;  %v3484_v21 = vadd.f32 %v2027_v18, %v2026_v12  ;;  %v2029_v57 = vpop.f32.mrb[10].mxu0 }
 0x1da   :  { %v3486_v54 = vadd.f32 %v2075_v61, %v2074_v26  ;;  %v2077_v7 = vpop.f32.mrb[10].mxu1  ;;  %v2030_v31 = vpop.f32.mrb[11].mxu0 }
 0x1db   :  { %v2078_v6 = vpop.f32.mrb[11].mxu1  ;;  %v3488_v24 = vadd.f32 %v2030_v31, %v2029_v57  ;;  %v3518_v31 = vpop.permute.xlu1 %1682 }
 0x1dc   :  { %v3490_v43 = vadd.f32 %v2078_v6, %v2077_v7  ;;  %v3516_v7 = vpop.permute.xlu0 %1662  ;;  %3741 = vst [vmem:[#allocation22_spill] sm:$0xff] %v3518_v31 }
 0x1dd   :  { %3740 = vst [vmem:[#allocation21_spill] sm:$0xff] %v3516_v7 }
 0x1df   :  { %v2032_v36 = vpop.f32.mrb[12].mxu0 }
 0x1e0   :  { %v2080_v60 = vpop.f32.mrb[12].mxu1  ;;  %v2033_v62 = vpop.f32.mrb[13].mxu0 }
 0x1e1   :  { %v2081_v20 = vpop.f32.mrb[13].mxu1  ;;  %v3496_v32 = vadd.f32 %v2033_v62, %v2032_v36  ;;  %v2035_v4 = vpop.f32.mrb[14].mxu0 }
 0x1e2   :  { %v3498_v50 = vadd.f32 %v2081_v20, %v2080_v60  ;;  %v2083_v17 = vpop.f32.mrb[14].mxu1  ;;  %v2036_v33 = vpop.f32.mrb[15].mxu0 }
 0x1e3   :  { %v2084_v27 = vpop.f32.mrb[15].mxu1  ;;  %v3500_v48 = vadd.f32 %v2036_v33, %v2035_v4 }
 0x1e4   :  { %3735 = vst [vmem:[#allocation16_spill] sm:$0xff] %v3498_v50  ;;  %v3502_v22 = vadd.f32 %v2084_v27, %v2083_v17 }
 0x1e6   :  { %3736 = vst [vmem:[#allocation17_spill] sm:$0xff] %v3502_v22 }
 0x1e7   :  { %v2038_v30 = vpop.f32.mrb[16].mxu0 }
 0x1e8   :  { %v2086_v46 = vpop.f32.mrb[16].mxu1  ;;  %v2039_v38 = vpop.f32.mrb[17].mxu0 }
 0x1e9   :  { %v2087_v45 = vpop.f32.mrb[17].mxu1  ;;  %v3508_v56 = vadd.f32 %v2039_v38, %v2038_v30  ;;  %v2041_v8 = vpop.f32.mrb[18].mxu0 }
 0x1ea   :  { %v3510_v28 = vadd.f32 %v2087_v45, %v2086_v46  ;;  %v2089_v12 = vpop.f32.mrb[18].mxu1  ;;  %v2042_v26 = vpop.f32.mrb[19].mxu0 }
 0x1eb   :  { %v2090_v18 = vpop.f32.mrb[19].mxu1  ;;  %v3512_v61 = vadd.f32 %v2042_v26, %v2041_v8  ;;  %v3528_v45 = vpop.permute.xlu0 %1607 }
 0x1ec   :  { %3738 = vst [vmem:[#allocation19_spill] sm:$0xff] %v3510_v28  ;;  %v3514_v57 = vadd.f32 %v2090_v18, %v2089_v12  ;;  %v3530_v8 = vpop.permute.xlu1 %1627 }
 0x1ee   :  { %3739 = vst [vmem:[#allocation20_spill] sm:$0xff] %v3514_v57 }
 0x1ef   :  { %v2044_v6 = vpop.f32.mrb[20].mxu0 }
 0x1f0   :  { %v2092_v36 = vpop.f32.mrb[20].mxu1  ;;  %v2045_v60 = vpop.f32.mrb[21].mxu0 }
 0x1f1   :  { %v2093_v62 = vpop.f32.mrb[21].mxu1  ;;  %v3520_v20 = vadd.f32 %v2045_v60, %v2044_v6  ;;  %v2047_v17 = vpop.f32.mrb[22].mxu0 }
 0x1f2   :  { %v3522_v4 = vadd.f32 %v2093_v62, %v2092_v36  ;;  %v2095_v33 = vpop.f32.mrb[22].mxu1  ;;  %v2048_v27 = vpop.f32.mrb[23].mxu0 }
 0x1f3   :  { %v2096_v30 = vpop.f32.mrb[23].mxu1  ;;  %v3524_v46 = vadd.f32 %v2048_v27, %v2047_v17  ;;  %v3540_v27 = vpop.permute.xlu0 %1647 }
 0x1f4   :  { %3742 = vst [vmem:[#allocation23_spill] sm:$0xff] %v3522_v4  ;;  %v3526_v38 = vadd.f32 %v2096_v30, %v2095_v33  ;;  %3746 = vst [vmem:[#allocation27_spill] sm:$0xff] %v3540_v27  ;;  %v3542_v30 = vpop.permute.xlu1 %1667 }
 0x1f5   :  { %3747 = vst [vmem:[#allocation28_spill] sm:$0xff] %v3542_v30 }
 0x1f6   :  { %3743 = vst [vmem:[#allocation24_spill] sm:$0xff] %v3526_v38 }
 0x1f7   :  { %v2050_v12 = vpop.f32.mrb[24].mxu0 }
 0x1f8   :  { %v2098_v26 = vpop.f32.mrb[24].mxu1  ;;  %v2051_v18 = vpop.f32.mrb[25].mxu0 }
 0x1f9   :  { %v2099_v31 = vpop.f32.mrb[25].mxu1  ;;  %v3532_v6 = vadd.f32 %v2051_v18, %v2050_v12  ;;  %v2053_v60 = vpop.f32.mrb[26].mxu0 }
 0x1fa   :  { %v3534_v36 = vadd.f32 %v2099_v31, %v2098_v26  ;;  %v2101_v62 = vpop.f32.mrb[26].mxu1  ;;  %v2054_v52 = vpop.f32.mrb[27].mxu0 }
 0x1fb   :  { %v2102_v37 = vpop.f32.mrb[27].mxu1  ;;  %v3536_v17 = vadd.f32 %v2054_v52, %v2053_v60  ;;  %v3552_v60 = vpop.permute.xlu0 %1687 }
 0x1fc   :  { %3744 = vst [vmem:[#allocation25_spill] sm:$0xff] %v3534_v36  ;;  %v3538_v33 = vadd.f32 %v2102_v37, %v2101_v62  ;;  %3750 = vst [vmem:[#allocation31_spill] sm:$0xff] %v3552_v60  ;;  %v3554_v62 = vpop.permute.xlu1 %1755 }
 0x1fe   :  { %3745 = vst [vmem:[#allocation26_spill] sm:$0xff] %v3538_v33 }
 0x1ff   :  { %v2056_v7 = vpop.f32.mrb[28].mxu0  ;;  %v3558_v60 = vpop.permute.xlu0 %1759 }
 0x200   :  { %v2104_v38 = vpop.f32.mrb[28].mxu1  ;;  %v2057_v4 = vpop.f32.mrb[29].mxu0 }
 0x201   :  { %v2105_v0 = vpop.f32.mrb[29].mxu1  ;;  %v3544_v12 = vadd.f32 %v2057_v4, %v2056_v7  ;;  %v2059_v26 = vpop.f32.mrb[30].mxu0 }
 0x202   :  { %v3546_v31 = vadd.f32 %v2105_v0, %v2104_v38  ;;  %v2107_v18 = vpop.f32.mrb[30].mxu1  ;;  %v2060_v36 = vpop.f32.mrb[31].mxu0 }
 0x203   :  { %v2108_v40 = vpop.f32.mrb[31].mxu1  ;;  %v3548_v52 = vadd.f32 %v2060_v36, %v2059_v26 }
 0x204   :  { %3748 = vst [vmem:[#allocation29_spill] sm:$0xff] %v3546_v31  ;;  %v3550_v37 = vadd.f32 %v2108_v40, %v2107_v18 }
 0x206   :  { %3749 = vst [vmem:[#allocation30_spill] sm:$0xff] %v3550_v37  ;;  %v3560_v37 = vpop.permute.xlu1 %1763 }
 0x207   :  { %v2238_v30 = vpop.f32.mrb[32].mxu0 }
 0x208   :  { %v2126_v33 = vpop.f32.mrb[32].mxu1  ;;  %v2239_v28 = vpop.f32.mrb[33].mxu0 }
 0x209   :  { %v2127_v57 = vpop.f32.mrb[33].mxu1  ;;  %v2240_v4 = vadd.f32 %v2239_v28, %v2238_v30  ;;  %v2241_v38 = vpop.f32.mrb[34].mxu0 }
 0x20a   :  { %v2128_v7 = vadd.f32 %v2127_v57, %v2126_v33  ;;  %v2129_v0 = vpop.f32.mrb[34].mxu1  ;;  %v2242_v27 = vpop.f32.mrb[35].mxu0 }
 0x20b   :  { %v2130_v31 = vpop.f32.mrb[35].mxu1  ;;  %v2243_v26 = vadd.f32 %v2242_v27, %v2241_v38 }
 0x20c   :  { %v1055_v29 = vadd.f32 %v2128_v7, %v3460_v9  ;;  %v2131_v36 = vadd.f32 %v2130_v31, %v2129_v0 }
 0x20e   :  { %v1502_v40 = vadd.f32 %v2240_v4, %v1055_v29  ;;  %v1058_v18 = vadd.f32 %v2131_v36, %v3464_v11 }
 0x20f   :  { %v2244_v28 = vpop.f32.mrb[36].mxu0 }
 0x210   :  { %v1690_v22 = vadd.f32 %v3424_v58, %v1502_v40  ;;  %v1503_v50 = vadd.f32 %v2243_v26, %v1058_v18  ;;  %v2132_v57 = vpop.f32.mrb[36].mxu1  ;;  %v2245_v30 = vpop.f32.mrb[37].mxu0 }
 0x211   :  { %v2133_v33 = vpop.f32.mrb[37].mxu1  ;;  %v2246_v31 = vadd.f32 %v2245_v30, %v2244_v28  ;;  %v2247_v29 = vpop.f32.mrb[38].mxu0 }
 0x212   :  { %v1722_v59 = vmax.f32 %v1690_v22, 0.0  ;;  %v1691_v51 = vadd.f32 %v3421_v16, %v1503_v50  ;;  %v2134_v9 = vadd.f32 %v2133_v33, %v2132_v57  ;;  %v2135_v27 = vpop.f32.mrb[38].mxu1  ;;  %v2248_v11 = vpop.f32.mrb[39].mxu0 }
 0x213   :  { %v2136_v7 = vpop.f32.mrb[39].mxu1  ;;  %v2249_v36 = vadd.f32 %v2248_v11, %v2247_v29  ;;  %v3568_v18 = vpop.permute.xlu1 %1767 }
 0x214   :  { %v1723_v4 = vmax.f32 %v1691_v51, 0.0  ;;  %v1063_v0 = vadd.f32 %v2134_v9, %v3472_v35  ;;  %v2137_v38 = vadd.f32 %v2136_v7, %v2135_v27  ;;  %v1770_v26 = vmul.f32 %v3554_v62, %v1722_v59 }
 0x216   :  { %v1504_v58 = vadd.f32 %v2246_v31, %v1063_v0  ;;  %v1066_v40 = vadd.f32 %v2137_v38, %v3476_v23  ;;  %v1771_v22 = vmul.f32 %v3558_v60, %v1723_v4 }
 0x217   :  { %v2250_v28 = vpop.f32.mrb[40].mxu0 }
 0x218   :  { %v1692_v16 = vadd.f32 %v3426_v2, %v1504_v58  ;;  %v1505_v50 = vadd.f32 %v2249_v36, %v1066_v40  ;;  %v2138_v57 = vpop.f32.mrb[40].mxu1  ;;  %v1774_v33 = vadd.f32 %v1771_v22, %v1770_v26  ;;  %v2251_v30 = vpop.f32.mrb[41].mxu0 }
 0x219   :  { %v2139_v51 = vpop.f32.mrb[41].mxu1  ;;  %v2252_v27 = vadd.f32 %v2251_v30, %v2250_v28  ;;  %v2253_v29 = vpop.f32.mrb[42].mxu0 }
 0x21a   :  { %v1724_v35 = vmax.f32 %v1692_v16, 0.0  ;;  %v1693_v9 = vadd.f32 %v3429_v63, %v1505_v50  ;;  %v2140_v31 = vadd.f32 %v2139_v51, %v2138_v57  ;;  %v2141_v59 = vpop.f32.mrb[42].mxu1  ;;  %v2254_v7 = vpop.f32.mrb[43].mxu0 }
 0x21b   :  { %v2142_v23 = vpop.f32.mrb[43].mxu1  ;;  %v2255_v38 = vadd.f32 %v2254_v7, %v2253_v29 }
 0x21c   :  { %v1725_v11 = vmax.f32 %v1693_v9, 0.0  ;;  %v1772_v4 = vmul.f32 %v3560_v37, %v1724_v35  ;;  %v1071_v2 = vadd.f32 %v2140_v31, %v3484_v21  ;;  %v2143_v0 = vadd.f32 %v2142_v23, %v2141_v59 }
 0x21e   :  { %v1506_v36 = vadd.f32 %v2252_v27, %v1071_v2  ;;  %v1074_v58 = vadd.f32 %v2143_v0, %v3488_v24  ;;  %v1773_v26 = vmul.f32 %v3568_v18, %v1725_v11  ;;  %v1775_v40 = vadd.f32 %v1774_v33, %v1772_v4 }
 0x21f   :  { %v2256_v57 = vpop.f32.mrb[44].mxu0 }
 0x220   :  { %v1694_v63 = vadd.f32 %v3431_v49, %v1506_v36  ;;  %v1507_v22 = vadd.f32 %v2255_v38, %v1074_v58  ;;  %v1776_v16 = vadd.f32 %v1775_v40, %v1773_v26  ;;  %v2144_v50 = vpop.f32.mrb[44].mxu1  ;;  %v2257_v51 = vpop.f32.mrb[45].mxu0 }
 0x221   :  { %v2145_v28 = vpop.f32.mrb[45].mxu1  ;;  %v2259_v27 = vpop.f32.mrb[46].mxu0  ;;  %v2258_v59 = vadd.f32 %v2257_v51, %v2256_v57 }
 0x222   :  { %v1726_v30 = vmax.f32 %v1694_v63, 0.0  ;;  %v1695_v35 = vadd.f32 %v3435_v34, %v1507_v22  ;;  %v1777_v21 = vrot.slane %v1776_v16, 4  ;;  %v2146_v9 = vadd.f32 %v2145_v28, %v2144_v50  ;;  %v2147_v31 = vpop.f32.mrb[46].mxu1  ;;  %v2260_v29 = vpop.f32.mrb[47].mxu0 }
 0x223   :  { %v2148_v24 = vpop.f32.mrb[47].mxu1  ;;  %v2261_v11 = vadd.f32 %v2260_v29, %v2259_v27 }
 0x224   :  { %v1727_v23 = vmax.f32 %v1695_v35, 0.0  ;;  %v1778_v33 = vadd.f32 %v1777_v21, %v1776_v16  ;;  %v1079_v49 = vadd.f32 %v2146_v9, %v3496_v32  ;;  %v2149_v7 = vadd.f32 %v2148_v24, %v2147_v31  ;;  %v3586_v24 = vpop.permute.xlu0 %1785 }
 0x225   :  { %v1790_v4 = vmul.f32 %v3554_v62, %v1726_v30 }
 0x226   :  { %v1791_v2 = vmul.f32 %v3558_v60, %v1727_v23  ;;  %v1508_v0 = vadd.f32 %v2258_v59, %v1079_v49  ;;  %v1779_v38 = vrot.slane %v1778_v33, 2  ;;  %v1082_v34 = vadd.f32 %v2149_v7, %v3500_v48 }
 0x227   :  { %v2262_v40 = vpop.f32.mrb[48].mxu0 }
 0x228   :  { %v1794_v36 = vadd.f32 %v1791_v2, %v1790_v4  ;;  %v1696_v58 = vadd.f32 %v3437_v42, %v1508_v0  ;;  %v2150_v26 = vpop.f32.mrb[48].mxu1  ;;  %v1780_v63 = vadd.f32 %v1779_v38, %v1778_v33  ;;  %v1509_v22 = vadd.f32 %v2261_v11, %v1082_v34  ;;  %v2263_v50 = vpop.f32.mrb[49].mxu0 }
 0x229   :  { %v2151_v16 = vpop.f32.mrb[49].mxu1  ;;  %v2264_v28 = vadd.f32 %v2263_v50, %v2262_v40  ;;  %v2265_v30 = vpop.f32.mrb[50].mxu0 }
 0x22a   :  { %v1728_v32 = vmax.f32 %v1696_v58, 0.0  ;;  %v2152_v57 = vadd.f32 %v2151_v16, %v2150_v26  ;;  %v2153_v51 = vpop.f32.mrb[50].mxu1  ;;  %v1781_v35 = vrot.slane %v1780_v63, 1  ;;  %v1697_v21 = vadd.f32 %v3440_v3, %v1509_v22  ;;  %v2266_v31 = vpop.f32.mrb[51].mxu0 }
 0x22b   :  { %v2154_v9 = vpop.f32.mrb[51].mxu1  ;;  %v2267_v59 = vadd.f32 %v2266_v31, %v2265_v30 }
 0x22c   :  { %v1792_v48 = vmul.f32 %v3560_v37, %v1728_v32  ;;  %v1087_v42 = vadd.f32 %v2152_v57, %v3508_v56  ;;  %v2155_v27 = vadd.f32 %v2154_v9, %v2153_v51  ;;  %v1729_v29 = vmax.f32 %v1697_v21, 0.0 }
 0x22d   :  { %v1782_v23 = vadd.f32 %v1781_v35, %v1780_v63 }
 0x22e   :  { %v1795_v33 = vadd.f32 %v1794_v36, %v1792_v48  ;;  %v1510_v49 = vadd.f32 %v2264_v28, %v1087_v42  ;;  %v1090_v7 = vadd.f32 %v2155_v27, %v3512_v61  ;;  %v1793_v11 = vmul.f32 %v3568_v18, %v1729_v29 }
 0x22f   :  { %v1788_v3 = vadd.f32 %v3586_v24, %v1782_v23  ;;  %v2268_v38 = vpop.f32.mrb[52].mxu0 }
 0x230   :  { %v1698_v4 = vadd.f32 %v3442_v10, %v1510_v49  ;;  %v1511_v2 = vadd.f32 %v2267_v59, %v1090_v7  ;;  %v2156_v0 = vpop.f32.mrb[52].mxu1  ;;  %v1796_v56 = vadd.f32 %v1795_v33, %v1793_v11  ;;  %v2269_v58 = vpop.f32.mrb[53].mxu0 }
 0x231   :  { %1789 = vst [vmem:[#allocation7] sm:$0x1] %v1788_v3  ;;  %v2157_v34 = vpop.f32.mrb[53].mxu1  ;;  %v2270_v63 = vadd.f32 %v2269_v58, %v2268_v38  ;;  %v2271_v61 = vpop.f32.mrb[54].mxu0 }
 0x232   :  { %v1730_v26 = vmax.f32 %v1698_v4, 0.0  ;;  %v1699_v40 = vadd.f32 %v3444_v13, %v1511_v2  ;;  %v2158_v36 = vadd.f32 %v2157_v34, %v2156_v0  ;;  %v2159_v22 = vpop.f32.mrb[54].mxu1  ;;  %v1797_v16 = vrot.slane %v1796_v56, 4  ;;  %v2272_v32 = vpop.f32.mrb[55].mxu0 }
 0x233   :  { %v2160_v50 = vpop.f32.mrb[55].mxu1  ;;  %v2273_v30 = vadd.f32 %v2272_v32, %v2271_v61 }
 0x234   :  { %v1731_v57 = vmax.f32 %v1699_v40, 0.0  ;;  %v1095_v10 = vadd.f32 %v2158_v36, %v3520_v20  ;;  %v2161_v28 = vadd.f32 %v2160_v50, %v2159_v22  ;;  %v1798_v51 = vadd.f32 %v1797_v16, %v1796_v56 }
 0x235   :  { %v1805_v35 = vmul.f32 %v3554_v62, %v1730_v26 }
 0x236   :  { %v1806_v21 = vmul.f32 %v3558_v60, %v1731_v57  ;;  %v1512_v9 = vadd.f32 %v2270_v63, %v1095_v10  ;;  %v1098_v13 = vadd.f32 %v2161_v28, %v3524_v46  ;;  %v1799_v31 = vrot.slane %v1798_v51, 2 }
 0x237   :  { %v2274_v29 = vpop.f32.mrb[56].mxu0 }
 0x238   :  { %v1809_v48 = vadd.f32 %v1806_v21, %v1805_v35  ;;  %v1700_v42 = vadd.f32 %v3446_v41, %v1512_v9  ;;  %v1513_v27 = vadd.f32 %v2273_v30, %v1098_v13  ;;  %v2162_v59 = vpop.f32.mrb[56].mxu1  ;;  %v1800_v23 = vadd.f32 %v1799_v31, %v1798_v51  ;;  %v2275_v20 = vpop.f32.mrb[57].mxu0 }
 0x239   :  { %v2163_v33 = vpop.f32.mrb[57].mxu1  ;;  %v2276_v3 = vadd.f32 %v2275_v20, %v2274_v29  ;;  %v2277_v2 = vpop.f32.mrb[58].mxu0 }
 0x23a   :  { %v1732_v49 = vmax.f32 %v1700_v42, 0.0  ;;  %v1701_v7 = vadd.f32 %v3448_v19, %v1513_v27  ;;  %v2164_v11 = vadd.f32 %v2163_v33, %v2162_v59  ;;  %v2165_v4 = vpop.f32.mrb[58].mxu1  ;;  %v1801_v0 = vrot.slane %v1800_v23, 1  ;;  %v2278_v46 = vpop.f32.mrb[59].mxu0 }
 0x23b   :  { %v2166_v38 = vpop.f32.mrb[59].mxu1  ;;  %v2279_v40 = vadd.f32 %v2278_v46, %v2277_v2 }
 0x23c   :  { %v1807_v56 = vmul.f32 %v3560_v37, %v1732_v49  ;;  %v1733_v34 = vmax.f32 %v1701_v7, 0.0  ;;  %v1103_v41 = vadd.f32 %v2164_v11, %v3532_v6  ;;  %v2167_v58 = vadd.f32 %v2166_v38, %v2165_v4 }
 0x23d   :  { %v1802_v26 = vadd.f32 %v1801_v0, %v1800_v23 }
 0x23e   :  { %v1810_v36 = vadd.f32 %v1809_v48, %v1807_v56  ;;  %v1808_v63 = vmul.f32 %v3568_v18, %v1733_v34  ;;  %v1514_v22 = vadd.f32 %v2276_v3, %v1103_v41  ;;  %v1106_v19 = vadd.f32 %v2167_v58, %v3536_v17 }
 0x23f   :  { %v1803_v61 = vadd.f32 %v1802_v26, %v3586_v24  ;;  %v2280_v10 = vpop.f32.mrb[60].mxu0 }
 0x240   :  { %v1811_v16 = vadd.f32 %v1810_v36, %v1808_v63  ;;  %v1702_v50 = vadd.f32 %v3450_v39, %v1514_v22  ;;  %v1515_v32 = vadd.f32 %v2279_v40, %v1106_v19  ;;  %v2168_v57 = vpop.f32.mrb[60].mxu1  ;;  %v2281_v6 = vpop.f32.mrb[61].mxu0 }
 0x241   :  { %1804 = vst [vmem:[#allocation7 + $0x1] sm:$0x1] %v1803_v61  ;;  %v2169_v28 = vpop.f32.mrb[61].mxu1  ;;  %v2283_v13 = vpop.f32.mrb[62].mxu0  ;;  %v2282_v31 = vadd.f32 %v2281_v6, %v2280_v10 }
 0x242   :  { %v1812_v51 = vrot.slane %v1811_v16, 4  ;;  %v1734_v30 = vmax.f32 %v1702_v50, 0.0  ;;  %v1703_v35 = vadd.f32 %v3452_v15, %v1515_v32  ;;  %v2170_v21 = vadd.f32 %v2169_v28, %v2168_v57  ;;  %v2171_v9 = vpop.f32.mrb[62].mxu1  ;;  %v2284_v48 = vpop.f32.mrb[63].mxu0 }
 0x243   :  { %v2172_v17 = vpop.f32.mrb[63].mxu1  ;;  %v2285_v29 = vadd.f32 %v2284_v48, %v2283_v13 }
 0x244   :  { %v1813_v42 = vadd.f32 %v1812_v51, %v1811_v16  ;;  %v1735_v27 = vmax.f32 %v1703_v35, 0.0  ;;  %v1111_v39 = vadd.f32 %v2170_v21, %v3544_v12  ;;  %v2173_v59 = vadd.f32 %v2172_v17, %v2171_v9 }
 0x245   :  { %v1820_v33 = vmul.f32 %v3554_v62, %v1734_v30 }
 0x246   :  { %v1814_v23 = vrot.slane %v1813_v42, 2  ;;  %v1821_v20 = vmul.f32 %v3558_v60, %v1735_v27  ;;  %v1516_v49 = vadd.f32 %v2282_v31, %v1111_v39  ;;  %v1114_v15 = vadd.f32 %v2173_v59, %v3548_v52 }
 0x247   :  { %v2286_v2 = vpop.f32.mrb[64].mxu0 }
 0x248   :  { %v1815_v7 = vadd.f32 %v1814_v23, %v1813_v42  ;;  %v1824_v11 = vadd.f32 %v1821_v20, %v1820_v33  ;;  %v1704_v3 = vadd.f32 %v3494_v47, %v1516_v49  ;;  %v2174_v4 = vpop.f32.mrb[64].mxu1  ;;  %v1517_v0 = vadd.f32 %v2285_v29, %v1114_v15  ;;  %v2287_v46 = vpop.f32.mrb[65].mxu0 }
 0x249   :  { %v2175_v38 = vpop.f32.mrb[65].mxu1  ;;  %v2288_v41 = vadd.f32 %v2287_v46, %v2286_v2  ;;  %v2289_v26 = vpop.f32.mrb[66].mxu0 }
 0x24a   :  { %v1816_v12 = vrot.slane %v1815_v7, 1  ;;  %v1736_v56 = vmax.f32 %v1704_v3, 0.0  ;;  %v2176_v34 = vadd.f32 %v2175_v38, %v2174_v4  ;;  %v2177_v58 = vpop.f32.mrb[66].mxu1  ;;  %v1705_v40 = vadd.f32 %v3528_v45, %v1517_v0  ;;  %v2290_v63 = vpop.f32.mrb[67].mxu0 }
 0x24b   :  { %v2178_v36 = vpop.f32.mrb[67].mxu1  ;;  %v2291_v16 = vadd.f32 %v2290_v63, %v2289_v26 }
 0x24c   :  { %v1817_v52 = vadd.f32 %v1816_v12, %v1815_v7  ;;  %v1822_v22 = vmul.f32 %v3560_v37, %v1736_v56  ;;  %v1119_v47 = vadd.f32 %v2176_v34, %v3462_v44  ;;  %v2179_v19 = vadd.f32 %v2178_v36, %v2177_v58 }
 0x24d   :  { %v1737_v61 = vmax.f32 %v1705_v40, 0.0 }
 0x24e   :  { %v1818_v50 = vadd.f32 %v1817_v52, %v3586_v24  ;;  %v1825_v32 = vadd.f32 %v1824_v11, %v1822_v22  ;;  %v1518_v57 = vadd.f32 %v2288_v41, %v1119_v47  ;;  %v1122_v10 = vadd.f32 %v2179_v19, %v3466_v53 }
 0x24f   :  { %v1823_v28 = vmul.f32 %v3568_v18, %v1737_v61  ;;  %v2292_v30 = vpop.f32.mrb[68].mxu0 }
 0x250   :  { %1819 = vst [vmem:[#allocation7 + $0x2] sm:$0x1] %v1818_v50  ;;  %v1706_v45 = vadd.f32 %v3454_v55, %v1518_v57  ;;  %v1519_v6 = vadd.f32 %v2291_v16, %v1122_v10  ;;  %v2180_v51 = vpop.f32.mrb[68].mxu1  ;;  %v2293_v44 = vpop.f32.mrb[69].mxu0  ;;  %v3751_v10 = vld [vmem:[#allocation15_spill] sm:$0xff] }
 0x251   :  { %v1826_v35 = vadd.f32 %v1825_v32, %v1823_v28  ;;  %v2181_v21 = vpop.f32.mrb[69].mxu1  ;;  %v2294_v17 = vadd.f32 %v2293_v44, %v2292_v30  ;;  %v2295_v42 = vpop.f32.mrb[70].mxu0  ;;  %v3752_v44 = vld [vmem:[#allocation14_spill] sm:$0xff] }
 0x252   :  { %v1738_v9 = vmax.f32 %v1706_v45, 0.0  ;;  %v1707_v13 = vadd.f32 %v3456_v25, %v1519_v6  ;;  %v2182_v31 = vadd.f32 %v2181_v21, %v2180_v51  ;;  %v2183_v48 = vpop.f32.mrb[70].mxu1  ;;  %v2296_v39 = vpop.f32.mrb[71].mxu0 }
 0x253   :  { %v1827_v27 = vrot.slane %v1826_v35, 4  ;;  %v2184_v53 = vpop.f32.mrb[71].mxu1  ;;  %v2297_v33 = vadd.f32 %v2296_v39, %v2295_v42  ;;  %v3753_v39 = vld [vmem:[#allocation16_spill] sm:$0xff] }
 0x254   :  { %v1739_v59 = vmax.f32 %v1707_v13, 0.0  ;;  %v1127_v29 = vadd.f32 %v2182_v31, %v3474_v1  ;;  %v2185_v55 = vadd.f32 %v2184_v53, %v2183_v48  ;;  %v1835_v20 = vmul.f32 %v3554_v62, %v1738_v9 }
 0x255   :  { %v1828_v23 = vadd.f32 %v1827_v27, %v1826_v35 }
 0x256   :  { %v1836_v49 = vmul.f32 %v3558_v60, %v1739_v59  ;;  %v1520_v15 = vadd.f32 %v2294_v17, %v1127_v29  ;;  %v1130_v25 = vadd.f32 %v2185_v55, %v3478_v14 }
 0x257   :  { %v1829_v7 = vrot.slane %v1828_v23, 2  ;;  %v2298_v0 = vpop.f32.mrb[72].mxu0 }
 0x258   :  { %v1839_v11 = vadd.f32 %v1836_v49, %v1835_v20  ;;  %v1708_v3 = vadd.f32 %v3504_v5, %v1520_v15  ;;  %v1521_v4 = vadd.f32 %v2297_v33, %v1130_v25  ;;  %v2186_v2 = vpop.f32.mrb[72].mxu1  ;;  %v2299_v1 = vpop.f32.mrb[73].mxu0  ;;  %v3754_v15 = vld [vmem:[#allocation17_spill] sm:$0xff] }
 0x259   :  { %v1830_v38 = vadd.f32 %v1829_v7, %v1828_v23  ;;  %v2187_v46 = vpop.f32.mrb[73].mxu1  ;;  %v2300_v41 = vadd.f32 %v2299_v1, %v2298_v0  ;;  %v2301_v26 = vpop.f32.mrb[74].mxu0 }
 0x25a   :  { %v1740_v12 = vmax.f32 %v1708_v3, 0.0  ;;  %v1709_v56 = vadd.f32 %v3530_v8, %v1521_v4  ;;  %v2188_v34 = vadd.f32 %v2187_v46, %v2186_v2  ;;  %v2189_v58 = vpop.f32.mrb[74].mxu1  ;;  %v2302_v14 = vpop.f32.mrb[75].mxu0  ;;  %v3755_v3 = vld [vmem:[#allocation18_spill] sm:$0xff] }
 0x25b   :  { %v1831_v40 = vrot.slane %v1830_v38, 1  ;;  %v2190_v36 = vpop.f32.mrb[75].mxu1  ;;  %v2303_v19 = vadd.f32 %v2302_v14, %v2301_v26 }
 0x25c   :  { %v1837_v63 = vmul.f32 %v3560_v37, %v1740_v12  ;;  %v1741_v52 = vmax.f32 %v1709_v56, 0.0  ;;  %v1135_v5 = vadd.f32 %v2188_v34, %v3486_v54  ;;  %v2191_v22 = vadd.f32 %v2190_v36, %v2189_v58 }
 0x25d   :  { %v1832_v47 = vadd.f32 %v1831_v40, %v1830_v38  ;;  %v3756_v40 = vld [vmem:[#allocation27_spill] sm:$0xff] }
 0x25e   :  { %v1840_v61 = vadd.f32 %v1839_v11, %v1837_v63  ;;  %v1838_v16 = vmul.f32 %v3568_v18, %v1741_v52  ;;  %v1522_v50 = vadd.f32 %v2300_v41, %v1135_v5  ;;  %v1138_v8 = vadd.f32 %v2191_v22, %v3490_v43  ;;  %v3757_v22 = vld [vmem:[#allocation19_spill] sm:$0xff] }
 0x25f   :  { %v1833_v32 = vadd.f32 %v1832_v47, %v3586_v24  ;;  %v2304_v51 = vpop.f32.mrb[76].mxu0 }
 0x260   :  { %v1841_v57 = vadd.f32 %v1840_v61, %v1838_v16  ;;  %v1710_v28 = vadd.f32 %v3751_v10, %v1522_v50  ;;  %v1523_v45 = vadd.f32 %v2303_v19, %v1138_v8  ;;  %v2192_v6 = vpop.f32.mrb[76].mxu1  ;;  %v2305_v54 = vpop.f32.mrb[77].mxu0 }
 0x261   :  { %1834 = vst [vmem:[#allocation7 + $0x3] sm:$0x1] %v1833_v32  ;;  %v2193_v30 = vpop.f32.mrb[77].mxu1  ;;  %v2307_v17 = vpop.f32.mrb[78].mxu0  ;;  %v2306_v48 = vadd.f32 %v2305_v54, %v2304_v51 }
 0x262   :  { %v1842_v35 = vrot.slane %v1841_v57, 4  ;;  %v1742_v21 = vmax.f32 %v1710_v28, 0.0  ;;  %v1711_v9 = vadd.f32 %v3752_v44, %v1523_v45  ;;  %v2194_v13 = vadd.f32 %v2193_v30, %v2192_v6  ;;  %v2195_v31 = vpop.f32.mrb[78].mxu1  ;;  %v2308_v42 = vpop.f32.mrb[79].mxu0  ;;  %v3759_v45 = vld [vmem:[#allocation11_spill] sm:$0xff] }
 0x263   :  { %v2196_v43 = vpop.f32.mrb[79].mxu1  ;;  %v2309_v55 = vadd.f32 %v2308_v42, %v2307_v17 }
 0x264   :  { %v1843_v27 = vadd.f32 %v1842_v35, %v1841_v57  ;;  %v1743_v53 = vmax.f32 %v1711_v9, 0.0  ;;  %v1143_v59 = vadd.f32 %v2194_v13, %v3753_v39  ;;  %v2197_v29 = vadd.f32 %v2196_v43, %v2195_v31  ;;  %v3758_v57 = vld [vmem:[#allocation20_spill] sm:$0xff]  ;;  %v3760_v13 = vld [vmem:[#allocation10_spill] sm:$0xff] }
 0x265   :  { %v1850_v33 = vmul.f32 %v3554_v62, %v1742_v21 }
 0x266   :  { %v1844_v23 = vrot.slane %v1843_v27, 2  ;;  %v1851_v20 = vmul.f32 %v3558_v60, %v1743_v53  ;;  %v1524_v49 = vadd.f32 %v2306_v48, %v1143_v59  ;;  %v1146_v25 = vadd.f32 %v2197_v29, %v3754_v15  ;;  %v3761_v29 = vld [vmem:[#allocation23_spill] sm:$0xff] }
 0x267   :  { %v2310_v0 = vpop.f32.mrb[80].mxu0 }
 0x268   :  { %v1845_v7 = vadd.f32 %v1844_v23, %v1843_v27  ;;  %v1854_v11 = vadd.f32 %v1851_v20, %v1850_v33  ;;  %v1712_v4 = vadd.f32 %v3755_v3, %v1524_v49  ;;  %v2198_v2 = vpop.f32.mrb[80].mxu1  ;;  %v1525_v38 = vadd.f32 %v2309_v55, %v1146_v25  ;;  %v2311_v1 = vpop.f32.mrb[81].mxu0 }
 0x269   :  { %v2199_v46 = vpop.f32.mrb[81].mxu1  ;;  %v2312_v41 = vadd.f32 %v2311_v1, %v2310_v0  ;;  %v2313_v26 = vpop.f32.mrb[82].mxu0 }
 0x26a   :  { %v1846_v12 = vrot.slane %v1845_v7, 1  ;;  %v1744_v56 = vmax.f32 %v1712_v4, 0.0  ;;  %v2200_v34 = vadd.f32 %v2199_v46, %v2198_v2  ;;  %v2201_v58 = vpop.f32.mrb[82].mxu1  ;;  %v1713_v36 = vadd.f32 %v3756_v40, %v1525_v38  ;;  %v2314_v63 = vpop.f32.mrb[83].mxu0  ;;  %v3763_v2 = vld [vmem:[#allocation21_spill] sm:$0xff] }
 0x26b   :  { %v2202_v14 = vpop.f32.mrb[83].mxu1  ;;  %v2315_v16 = vadd.f32 %v2314_v63, %v2313_v26 }
 0x26c   :  { %v1847_v52 = vadd.f32 %v1846_v12, %v1845_v7  ;;  %v1852_v5 = vmul.f32 %v3560_v37, %v1744_v56  ;;  %v1151_v47 = vadd.f32 %v2200_v34, %v3757_v22  ;;  %v2203_v19 = vadd.f32 %v2202_v14, %v2201_v58  ;;  %v3762_v7 = vld [vmem:[#allocation24_spill] sm:$0xff] }
 0x26d   :  { %v1745_v61 = vmax.f32 %v1713_v36, 0.0  ;;  %v3764_v58 = vld [vmem:[#allocation28_spill] sm:$0xff] }
 0x26e   :  { %v1848_v50 = vadd.f32 %v1847_v52, %v3586_v24  ;;  %v1855_v8 = vadd.f32 %v1854_v11, %v1852_v5  ;;  %v1526_v32 = vadd.f32 %v2312_v41, %v1151_v47  ;;  %v1154_v10 = vadd.f32 %v2203_v19, %v3758_v57 }
 0x26f   :  { %v1853_v28 = vmul.f32 %v3568_v18, %v1745_v61  ;;  %v2316_v54 = vpop.f32.mrb[84].mxu0  ;;  %v3765_v61 = vld [vmem:[#allocation25_spill] sm:$0xff] }
 0x270   :  { %1849 = vst [vmem:[#allocation7 + $0x4] sm:$0x1] %v1848_v50  ;;  %v1714_v6 = vadd.f32 %v3759_v45, %v1526_v32  ;;  %v1527_v51 = vadd.f32 %v2315_v16, %v1154_v10  ;;  %v2204_v30 = vpop.f32.mrb[84].mxu1  ;;  %v2317_v44 = vpop.f32.mrb[85].mxu0  ;;  %v3766_v45 = vld [vmem:[#allocation26_spill] sm:$0xff] }
 0x271   :  { %v1856_v35 = vadd.f32 %v1855_v8, %v1853_v28  ;;  %v2205_v21 = vpop.f32.mrb[85].mxu1  ;;  %v2318_v48 = vadd.f32 %v2317_v44, %v2316_v54  ;;  %v2319_v42 = vpop.f32.mrb[86].mxu0  ;;  %v3767_v54 = vld [vmem:[#allocation13_spill] sm:$0xff] }
 0x272   :  { %v1746_v9 = vmax.f32 %v1714_v6, 0.0  ;;  %v1715_v31 = vadd.f32 %v3760_v13, %v1527_v51  ;;  %v2206_v17 = vadd.f32 %v2205_v21, %v2204_v30  ;;  %v2207_v43 = vpop.f32.mrb[86].mxu1  ;;  %v2320_v39 = vpop.f32.mrb[87].mxu0 }
 0x273   :  { %v1857_v27 = vrot.slane %v1856_v35, 4  ;;  %v2208_v53 = vpop.f32.mrb[87].mxu1  ;;  %v2321_v20 = vadd.f32 %v2320_v39, %v2319_v42 }
 0x274   :  { %v1747_v59 = vmax.f32 %v1715_v31, 0.0  ;;  %v1159_v55 = vadd.f32 %v2206_v17, %v3761_v29  ;;  %v2209_v23 = vadd.f32 %v2208_v53, %v2207_v43  ;;  %v1865_v49 = vmul.f32 %v3554_v62, %v1746_v9  ;;  %v3768_v43 = vld [vmem:[#allocation12_spill] sm:$0xff] }
 0x275   :  { %v1858_v33 = vadd.f32 %v1857_v27, %v1856_v35 }
 0x276   :  { %v1866_v15 = vmul.f32 %v3558_v60, %v1747_v59  ;;  %v1528_v25 = vadd.f32 %v2318_v48, %v1159_v55  ;;  %v1162_v11 = vadd.f32 %v2209_v23, %v3762_v7 }
 0x277   :  { %v1859_v3 = vrot.slane %v1858_v33, 2  ;;  %v2322_v1 = vpop.f32.mrb[88].mxu0 }
 0x278   :  { %v1869_v4 = vadd.f32 %v1866_v15, %v1865_v49  ;;  %v1716_v0 = vadd.f32 %v3763_v2, %v1528_v25  ;;  %v1529_v38 = vadd.f32 %v2321_v20, %v1162_v11  ;;  %v2210_v46 = vpop.f32.mrb[88].mxu1  ;;  %v2323_v34 = vpop.f32.mrb[89].mxu0  ;;  %v3769_v20 = vld [vmem:[#allocation29_spill] sm:$0xff]  ;;  %v3770_v2 = vld [vmem:[#allocation30_spill] sm:$0xff] }
 0x279   :  { %v1860_v12 = vadd.f32 %v1859_v3, %v1858_v33  ;;  %v2211_v56 = vpop.f32.mrb[89].mxu1  ;;  %v2324_v36 = vadd.f32 %v2323_v34, %v2322_v1  ;;  %v2325_v63 = vpop.f32.mrb[90].mxu0  ;;  %v3771_v1 = vld [vmem:[#allocation22_spill] sm:$0xff] }
 0x27a   :  { %v1748_v41 = vmax.f32 %v1716_v0, 0.0  ;;  %v1717_v26 = vadd.f32 %v3764_v58, %v1529_v38  ;;  %v2212_v40 = vadd.f32 %v2211_v56, %v2210_v46  ;;  %v2213_v14 = vpop.f32.mrb[90].mxu1  ;;  %v2326_v22 = vpop.f32.mrb[91].mxu0  ;;  %v3772_v58 = vld [vmem:[#allocation31_spill] sm:$0xff] }
 0x27b   :  { %v1861_v52 = vrot.slane %v1860_v12, 1  ;;  %v2214_v5 = vpop.f32.mrb[91].mxu1  ;;  %v2327_v32 = vadd.f32 %v2326_v22, %v2325_v63 }
 0x27c   :  { %v1867_v47 = vmul.f32 %v3560_v37, %v1748_v41  ;;  %v1749_v19 = vmax.f32 %v1717_v26, 0.0  ;;  %v1167_v16 = vadd.f32 %v2212_v40, %v3765_v61  ;;  %v2215_v50 = vadd.f32 %v2214_v5, %v2213_v14 }
 0x27d   :  { %v1862_v8 = vadd.f32 %v1861_v52, %v1860_v12 }
 0x27e   :  { %v1870_v57 = vadd.f32 %v1869_v4, %v1867_v47  ;;  %v1868_v10 = vmul.f32 %v3568_v18, %v1749_v19  ;;  %v1530_v28 = vadd.f32 %v2324_v36, %v1167_v16  ;;  %v1170_v6 = vadd.f32 %v2215_v50, %v3766_v45 }
 0x27f   :  { %v1863_v51 = vadd.f32 %v1862_v8, %v3586_v24  ;;  %v2328_v9 = vpop.f32.mrb[92].mxu0 }
 0x280   :  { %v1871_v30 = vadd.f32 %v1870_v57, %v1868_v10  ;;  %v1718_v35 = vadd.f32 %v3767_v54, %v1530_v28  ;;  %v1531_v21 = vadd.f32 %v2327_v32, %v1170_v6  ;;  %v2216_v44 = vpop.f32.mrb[92].mxu1  ;;  %v2329_v31 = vpop.f32.mrb[93].mxu0 }
 0x281   :  { %1864 = vst [vmem:[#allocation7 + $0x5] sm:$0x1] %v1863_v51  ;;  %v2217_v13 = vpop.f32.mrb[93].mxu1  ;;  %v2331_v39 = vpop.f32.mrb[94].mxu0  ;;  %v2330_v59 = vadd.f32 %v2329_v31, %v2328_v9 }
 0x282   :  { %v1872_v17 = vrot.slane %v1871_v30, 4  ;;  %v1750_v48 = vmax.f32 %v1718_v35, 0.0  ;;  %v1719_v42 = vadd.f32 %v3768_v43, %v1531_v21  ;;  %v2218_v27 = vadd.f32 %v2217_v13, %v2216_v44  ;;  %v2219_v53 = vpop.f32.mrb[94].mxu1  ;;  %v2332_v55 = vpop.f32.mrb[95].mxu0 }
 0x283   :  { %v2220_v29 = vpop.f32.mrb[95].mxu1  ;;  %v2333_v25 = vadd.f32 %v2332_v55, %v2331_v39 }
 0x284   :  { %v1873_v23 = vadd.f32 %v1872_v17, %v1871_v30  ;;  %v1751_v33 = vmax.f32 %v1719_v42, 0.0  ;;  %v1175_v49 = vadd.f32 %v2218_v27, %v3769_v20  ;;  %v2221_v15 = vadd.f32 %v2220_v29, %v2219_v53 }
 0x285   :  { %v1880_v11 = vmul.f32 %v3554_v62, %v1750_v48 }
 0x286   :  { %v1874_v7 = vrot.slane %v1873_v23, 2  ;;  %v1881_v3 = vmul.f32 %v3558_v60, %v1751_v33  ;;  %v1532_v4 = vadd.f32 %v2330_v59, %v1175_v49  ;;  %v1178_v0 = vadd.f32 %v2221_v15, %v3770_v2 }
 0x288   :  { %v1875_v38 = vadd.f32 %v1874_v7, %v1873_v23  ;;  %v1884_v46 = vadd.f32 %v1881_v3, %v1880_v11  ;;  %v1720_v12 = vadd.f32 %v3771_v1, %v1532_v4  ;;  %v1533_v56 = vadd.f32 %v2333_v25, %v1178_v0 }
 0x28a   :  { %v1876_v34 = vrot.slane %v1875_v38, 1  ;;  %v1752_v41 = vmax.f32 %v1720_v12, 0.0  ;;  %v1721_v26 = vadd.f32 %v3772_v58, %v1533_v56 }
 0x28c   :  { %v1877_v40 = vadd.f32 %v1876_v34, %v1875_v38  ;;  %v1882_v36 = vmul.f32 %v3560_v37, %v1752_v41  ;;  %v1753_v14 = vmax.f32 %v1721_v26, 0.0 }
 0x28e   :  { %v1878_v62 = vadd.f32 %v1877_v40, %v3586_v24  ;;  %v1885_v63 = vadd.f32 %v1884_v46, %v1882_v36  ;;  %v1883_v60 = vmul.f32 %v3568_v18, %v1753_v14 }
 0x290   :  { %1879 = vst [vmem:[#allocation7 + $0x6] sm:$0x1] %v1878_v62  ;;  %v1886_v52 = vadd.f32 %v1885_v63, %v1883_v60 }
 0x292   :  { %v1887_v5 = vrot.slane %v1886_v52, 4 }
 0x294   :  { %v1888_v22 = vadd.f32 %v1887_v5, %v1886_v52 }
 0x296   :  { %v1889_v47 = vrot.slane %v1888_v22, 2 }
 0x298   :  { %v1890_v19 = vadd.f32 %v1889_v47, %v1888_v22 }
 0x29a   :  { %v1891_v61 = vrot.slane %v1890_v19, 1 }
 0x29c   :  { %v1892_v16 = vadd.f32 %v1891_v61, %v1890_v19 }
 0x29e   :  { %v1893_v50 = vadd.f32 %v1892_v16, %v3586_v24 }
 0x2a0   :  { %1894 = vst [vmem:[#allocation7 + $0x7] sm:$0x1] %v1893_v50 }
 0x2a1   :  { %2510 = shalt.err (!%p2507_p12)
}
 0x2a2   :  { %s2511_s9 = scalar_lea.hbm %s3683_s3, 128 }
 0x2a3   :  { %p2512_p13 = scmp.ne.s32.totalorder %s3683_s3, %s2511_s9  ;;  %p2515_p0 = scmp.lt.u32.totalorder %s2511_s9, %s3683_s3 }
 0x2a5   :  { %p2517_p1 = pnand %p2515_p0, %p2512_p13 }
 0x2a7   :  { %2520 = shalt.err (!%p2517_p1)
}
 0x2a8   :  { %1904 = dma.vmem_to_hbm [thread:$0]  %s1902_s5, 128, %s3683_s3, [#allocation6]  }
 0x2a9   :  { %2523 = dma.done.wait [#allocation6], 128  }
 0x2aa   :  { %2524 = vsyncadd [#allocation6], 4294967168 }
 0x2ab   :  { %1908 = vsyncpa [#allocation5], 1 }
 0x2ac   :  { %1909 = vsyncpa [#allocation6], 1 }

</bundles_post_ra>
